<compile_context>
chip_gen: v7x
topology: tpu7x:2x2x1
jax: 0.10.0
libtpu: 0.0.40
codegen_flags: <defaults>
</compile_context>

<pallas_src>
import functools
import math

import jax
import jax.numpy as jnp
from jax.experimental import pallas as pl
from jax.experimental.pallas import tpu as pltpu


def _round_up(n, m):
    return -(-n // m) * m


def _pinn_kernel(x_ref, *refs, n_layers):
    """Run one batch tile through the whole MLP, feature-major.

    x_ref : (in_pad, tile_m)  f32, batch on the lane axis.
    refs  : (w0, b0, w1, b1, ..., wL, bL, o_ref); w_i is (out_i, in_i)
            (PyTorch layout), b_i is an (out_i, 1) column.
    o_ref : (out_pad, tile_m) f32, lane-dense output slab.
    """
    o_ref = refs[-1]
    prefs = refs[:-1]
    h = x_ref[...]
    for li in range(n_layers):
        w = prefs[2 * li][...]
        b = prefs[2 * li + 1][...]
        # MXU matmul; HIGHEST keeps the full-precision f32 decomposition.
        y = jnp.dot(w, h,
                    preferred_element_type=jnp.float32,
                    precision=jax.lax.Precision.HIGHEST) + b
        if li < n_layers - 1:
            y = jnp.tanh(y)  # EUP, fully lane-dense in this layout
        h = y
    o_ref[...] = h.astype(o_ref.dtype)


def pinn_forward(x, params, *, tile_m=2048):
    """x: (N, input_dim) float32. params: list of (W, b), W in (out, in) layout."""
    N, in_dim = x.shape
    n_layers = len(params)
    out_dim = params[-1][0].shape[0]

    # ---- tiling: batch on lanes; 128-multiple tiles; even #steps when >1 ----
    tile_m = max(128, min(int(tile_m), _round_up(N, 128)))
    tile_m = _round_up(tile_m, 128)
    steps = -(-N // tile_m)
    if steps > 1 and steps % 2 == 1:
        # v7x has 2 TensorCores sharing the "parallel" axis: keep the split
        # balanced.  One extra all-zero tile is negligible on 1-TC chips.
        steps += 1
    n_pad = steps * tile_m

    # ---- feature-major input: (in_pad, n_pad), zero-padded ----
    in_pad = _round_up(in_dim, 8)
    x_t = jnp.zeros((in_pad, n_pad), jnp.float32).at[:in_dim, :N].set(x.T)

    # ---- params: W kept (out, in); layer-0 K padded to in_pad, last-layer M
    #      padded to out_pad (zero rows -> zero outputs, sliced off below);
    #      biases become (out, 1) columns. ----
    out_pad = _round_up(out_dim, 8)
    flat = []
    for li, (w, b) in enumerate(params):
        w = jnp.asarray(w, jnp.float32)
        b = jnp.asarray(b, jnp.float32).reshape(-1, 1)
        if li == 0 and w.shape[1] != in_pad:
            w = jnp.zeros((w.shape[0], in_pad), jnp.float32).at[:, :in_dim].set(w)
        if li == n_layers - 1 and w.shape[0] != out_pad:
            w = jnp.zeros((out_pad, w.shape[1]), jnp.float32).at[:out_dim, :].set(w)
            b = jnp.zeros((out_pad, 1), jnp.float32).at[:out_dim, :].set(b)
        flat += [w, b]

    in_specs = [pl.BlockSpec((in_pad, tile_m), lambda i: (0, i))]
    # Constant index_map -> each weight/bias is DMA'd once and stays resident.
    in_specs += [pl.BlockSpec(p.shape, lambda i: (0, 0)) for p in flat]

    call = pl.pallas_call(
        functools.partial(_pinn_kernel, n_layers=n_layers),
        out_shape=jax.ShapeDtypeStruct((out_pad, n_pad), jnp.float32),
        grid_spec=pltpu.PrefetchScalarGridSpec(
            num_scalar_prefetch=0,
            grid=(steps,),
            in_specs=in_specs,
            out_specs=pl.BlockSpec((out_pad, tile_m), lambda i: (0, i)),
        ),
        compiler_params=pltpu.CompilerParams(
            dimension_semantics=("parallel",)),
    )
    out_t = call(x_t, *flat)          # (out_pad, n_pad), lane-dense slab
    return out_t[:out_dim, :N].T      # back to PyTorch (N, out_dim)


def init_pinn_params(key, input_dim=3, hidden_dim=64, hidden_layers=4,
                     output_dim=1):
    """Xavier-normal weights, zero biases (matches PINN.initialize_weights).

    Weights are stored in PyTorch layout: (out_features, in_features)."""
    dims = [input_dim] + [hidden_dim] * hidden_layers + [output_dim]
    params = []
    for fan_in, fan_out in zip(dims[:-1], dims[1:]):
        key, sub = jax.random.split(key)
        std = math.sqrt(2.0 / (fan_in + fan_out))
        w = std * jax.random.normal(sub, (fan_out, fan_in), dtype=jnp.float32)
        b = jnp.zeros((fan_out,), dtype=jnp.float32)
        params.append((w, b))
    return params


def pinn_reference(x, params):
    """Pure-JAX reference: Linear (+Tanh between layers), PyTorch semantics."""
    h = x
    for i, (w, b) in enumerate(params):
        h = jnp.dot(h, w.T, precision=jax.lax.Precision.HIGHEST) + b
        if i < len(params) - 1:
            h = jnp.tanh(h)
    return h


if __name__ == "__main__":
    key = jax.random.PRNGKey(0)
    pkey, xkey1, xkey2 = jax.random.split(key, 3)

    # Module defaults: Linear(3,64) Tanh [Linear(64,64) Tanh]*3 Linear(64,1)
    params = init_pinn_params(pkey, input_dim=3, hidden_dim=64,
                              hidden_layers=4, output_dim=1)

    # Small batch of collocation points (N, 3), e.g. (x, y, t).
    N = 256
    x = jax.random.normal(xkey1, (N, 3), dtype=jnp.float32)
    out = jax.block_until_ready(pinn_forward(x, params))
    ref = pinn_reference(x, params)
    assert out.shape == (N, 1)
    assert jnp.allclose(out, ref, atol=1e-5, rtol=1e-5), "mismatch vs reference"

    # Ragged batch: exercises the lane-padding path.
    N2 = 200
    x2 = jax.random.normal(xkey2, (N2, 3), dtype=jnp.float32)
    out2 = jax.block_until_ready(pinn_forward(x2, params))
    ref2 = pinn_reference(x2, params)
    assert out2.shape == (N2, 1)
    assert jnp.allclose(out2, ref2, atol=1e-5, rtol=1e-5), "mismatch (padded)"

    print("KERNEL_OK")
</pallas_src>

<mosaic_0001>
module attributes {stable_mosaic.version = 11 : i64} {
  func.func @_pinn_kernel(%arg0: i32, %arg1: memref<8x256xf32, #tpu.memory_space<vmem>>, %arg2: memref<64x8xf32, #tpu.memory_space<vmem>>, %arg3: memref<64x1xf32, #tpu.memory_space<vmem>>, %arg4: memref<64x64xf32, #tpu.memory_space<vmem>>, %arg5: memref<64x1xf32, #tpu.memory_space<vmem>>, %arg6: memref<64x64xf32, #tpu.memory_space<vmem>>, %arg7: memref<64x1xf32, #tpu.memory_space<vmem>>, %arg8: memref<64x64xf32, #tpu.memory_space<vmem>>, %arg9: memref<64x1xf32, #tpu.memory_space<vmem>>, %arg10: memref<8x64xf32, #tpu.memory_space<vmem>>, %arg11: memref<8x1xf32, #tpu.memory_space<vmem>>, %arg12: memref<8x256xf32, #tpu.memory_space<vmem>>) attributes {dimension_semantics = [#tpu.dimension_semantics<parallel>], iteration_bounds = array<i64: 1>, scalar_prefetch = 0 : i64, scratch_operands = 0 : i64, tpu.core_type = #tpu.core_type<tc>, window_params = [{transform_indices = @transform_0, window_bounds = array<i64: 8, 256>}, {pipeline_mode = #tpu.pipeline_mode<synchronous>, transform_indices = @transform_1, window_bounds = array<i64: 64, 8>}, {pipeline_mode = #tpu.pipeline_mode<synchronous>, transform_indices = @transform_2, window_bounds = array<i64: 64, 1>}, {pipeline_mode = #tpu.pipeline_mode<synchronous>, transform_indices = @transform_3, window_bounds = array<i64: 64, 64>}, {pipeline_mode = #tpu.pipeline_mode<synchronous>, transform_indices = @transform_4, window_bounds = array<i64: 64, 1>}, {pipeline_mode = #tpu.pipeline_mode<synchronous>, transform_indices = @transform_5, window_bounds = array<i64: 64, 64>}, {pipeline_mode = #tpu.pipeline_mode<synchronous>, transform_indices = @transform_6, window_bounds = array<i64: 64, 1>}, {pipeline_mode = #tpu.pipeline_mode<synchronous>, transform_indices = @transform_7, window_bounds = array<i64: 64, 64>}, {pipeline_mode = #tpu.pipeline_mode<synchronous>, transform_indices = @transform_8, window_bounds = array<i64: 64, 1>}, {pipeline_mode = #tpu.pipeline_mode<synchronous>, transform_indices = @transform_9, window_bounds = array<i64: 8, 64>}, {pipeline_mode = #tpu.pipeline_mode<synchronous>, transform_indices = @transform_10, window_bounds = array<i64: 8, 1>}, {transform_indices = @transform_11, window_bounds = array<i64: 8, 256>}]} {
    %c0 = arith.constant 0 : index
    %c0_0 = arith.constant 0 : index
    %0 = vector.load %arg1[%c0, %c0_0] : memref<8x256xf32, #tpu.memory_space<vmem>>, vector<8x256xf32>
    %c0_1 = arith.constant 0 : index
    %c0_2 = arith.constant 0 : index
    %1 = vector.load %arg2[%c0_1, %c0_2] : memref<64x8xf32, #tpu.memory_space<vmem>>, vector<64x8xf32>
    %c0_3 = arith.constant 0 : index
    %c0_4 = arith.constant 0 : index
    %2 = vector.load %arg3[%c0_3, %c0_4] : memref<64x1xf32, #tpu.memory_space<vmem>>, vector<64x1xf32>
    %cst = arith.constant dense<0.000000e+00> : vector<64x256xf32>
    %3 = tpu.matmul %1, %0, %cst {dimension_numbers = #tpu.dot_dimension_numbers<[1], [0], [0], [1], [0, 0, 1, 1], [], []>, precision = #tpu.contract_precision<fp32>} : vector<64x8xf32>, vector<8x256xf32>, vector<64x256xf32> -> vector<64x256xf32>
    %4 = vector.broadcast %2 : vector<64x1xf32> to vector<64x256xf32>
    %5 = arith.addf %3, %4 : vector<64x256xf32>
    %6 = math.tanh %5 : vector<64x256xf32>
    %c0_5 = arith.constant 0 : index
    %c0_6 = arith.constant 0 : index
    %7 = vector.load %arg4[%c0_5, %c0_6] : memref<64x64xf32, #tpu.memory_space<vmem>>, vector<64x64xf32>
    %c0_7 = arith.constant 0 : index
    %c0_8 = arith.constant 0 : index
    %8 = vector.load %arg5[%c0_7, %c0_8] : memref<64x1xf32, #tpu.memory_space<vmem>>, vector<64x1xf32>
    %cst_9 = arith.constant dense<0.000000e+00> : vector<64x256xf32>
    %9 = tpu.matmul %7, %6, %cst_9 {dimension_numbers = #tpu.dot_dimension_numbers<[1], [0], [0], [1], [0, 0, 1, 1], [], []>, precision = #tpu.contract_precision<fp32>} : vector<64x64xf32>, vector<64x256xf32>, vector<64x256xf32> -> vector<64x256xf32>
    %10 = vector.broadcast %8 : vector<64x1xf32> to vector<64x256xf32>
    %11 = arith.addf %9, %10 : vector<64x256xf32>
    %12 = math.tanh %11 : vector<64x256xf32>
    %c0_10 = arith.constant 0 : index
    %c0_11 = arith.constant 0 : index
    %13 = vector.load %arg6[%c0_10, %c0_11] : memref<64x64xf32, #tpu.memory_space<vmem>>, vector<64x64xf32>
    %c0_12 = arith.constant 0 : index
    %c0_13 = arith.constant 0 : index
    %14 = vector.load %arg7[%c0_12, %c0_13] : memref<64x1xf32, #tpu.memory_space<vmem>>, vector<64x1xf32>
    %cst_14 = arith.constant dense<0.000000e+00> : vector<64x256xf32>
    %15 = tpu.matmul %13, %12, %cst_14 {dimension_numbers = #tpu.dot_dimension_numbers<[1], [0], [0], [1], [0, 0, 1, 1], [], []>, precision = #tpu.contract_precision<fp32>} : vector<64x64xf32>, vector<64x256xf32>, vector<64x256xf32> -> vector<64x256xf32>
    %16 = vector.broadcast %14 : vector<64x1xf32> to vector<64x256xf32>
    %17 = arith.addf %15, %16 : vector<64x256xf32>
    %18 = math.tanh %17 : vector<64x256xf32>
    %c0_15 = arith.constant 0 : index
    %c0_16 = arith.constant 0 : index
    %19 = vector.load %arg8[%c0_15, %c0_16] : memref<64x64xf32, #tpu.memory_space<vmem>>, vector<64x64xf32>
    %c0_17 = arith.constant 0 : index
    %c0_18 = arith.constant 0 : index
    %20 = vector.load %arg9[%c0_17, %c0_18] : memref<64x1xf32, #tpu.memory_space<vmem>>, vector<64x1xf32>
    %cst_19 = arith.constant dense<0.000000e+00> : vector<64x256xf32>
    %21 = tpu.matmul %19, %18, %cst_19 {dimension_numbers = #tpu.dot_dimension_numbers<[1], [0], [0], [1], [0, 0, 1, 1], [], []>, precision = #tpu.contract_precision<fp32>} : vector<64x64xf32>, vector<64x256xf32>, vector<64x256xf32> -> vector<64x256xf32>
    %22 = vector.broadcast %20 : vector<64x1xf32> to vector<64x256xf32>
    %23 = arith.addf %21, %22 : vector<64x256xf32>
    %24 = math.tanh %23 : vector<64x256xf32>
    %c0_20 = arith.constant 0 : index
    %c0_21 = arith.constant 0 : index
    %25 = vector.load %arg10[%c0_20, %c0_21] : memref<8x64xf32, #tpu.memory_space<vmem>>, vector<8x64xf32>
    %c0_22 = arith.constant 0 : index
    %c0_23 = arith.constant 0 : index
    %26 = vector.load %arg11[%c0_22, %c0_23] : memref<8x1xf32, #tpu.memory_space<vmem>>, vector<8x1xf32>
    %cst_24 = arith.constant dense<0.000000e+00> : vector<8x256xf32>
    %27 = tpu.matmul %25, %24, %cst_24 {dimension_numbers = #tpu.dot_dimension_numbers<[1], [0], [0], [1], [0, 0, 1, 1], [], []>, precision = #tpu.contract_precision<fp32>} : vector<8x64xf32>, vector<64x256xf32>, vector<8x256xf32> -> vector<8x256xf32>
    %28 = vector.broadcast %26 : vector<8x1xf32> to vector<8x256xf32>
    %29 = arith.addf %27, %28 : vector<8x256xf32>
    %c0_25 = arith.constant 0 : index
    %c0_26 = arith.constant 0 : index
    %30 = vector.load %arg12[%c0_25, %c0_26] : memref<8x256xf32, #tpu.memory_space<vmem>>, vector<8x256xf32>
    tpu.vector_store %arg12[%c0_25, %c0_26], %29 {strides = array<i32>} : memref<8x256xf32, #tpu.memory_space<vmem>>, vector<8x256xf32>,
    return
  }
  func.func @transform_0(%arg0: i32) -> (i32, i32) {
    %c0_i32 = arith.constant 0 : i32
    %c0_i32_0 = arith.constant 0 : i32
    return %c0_i32, %arg0 : i32, i32
  }
  func.func @transform_1(%arg0: i32) -> (i32, i32) {
    %c0_i32 = arith.constant 0 : i32
    %c0_i32_0 = arith.constant 0 : i32
    %c0_i32_1 = arith.constant 0 : i32
    return %c0_i32, %c0_i32_0 : i32, i32
  }
  func.func @transform_2(%arg0: i32) -> (i32, i32) {
    %c0_i32 = arith.constant 0 : i32
    %c0_i32_0 = arith.constant 0 : i32
    %c0_i32_1 = arith.constant 0 : i32
    return %c0_i32, %c0_i32_0 : i32, i32
  }
  func.func @transform_3(%arg0: i32) -> (i32, i32) {
    %c0_i32 = arith.constant 0 : i32
    %c0_i32_0 = arith.constant 0 : i32
    %c0_i32_1 = arith.constant 0 : i32
    return %c0_i32, %c0_i32_0 : i32, i32
  }
  func.func @transform_4(%arg0: i32) -> (i32, i32) {
    %c0_i32 = arith.constant 0 : i32
    %c0_i32_0 = arith.constant 0 : i32
    %c0_i32_1 = arith.constant 0 : i32
    return %c0_i32, %c0_i32_0 : i32, i32
  }
  func.func @transform_5(%arg0: i32) -> (i32, i32) {
    %c0_i32 = arith.constant 0 : i32
    %c0_i32_0 = arith.constant 0 : i32
    %c0_i32_1 = arith.constant 0 : i32
    return %c0_i32, %c0_i32_0 : i32, i32
  }
  func.func @transform_6(%arg0: i32) -> (i32, i32) {
    %c0_i32 = arith.constant 0 : i32
    %c0_i32_0 = arith.constant 0 : i32
    %c0_i32_1 = arith.constant 0 : i32
    return %c0_i32, %c0_i32_0 : i32, i32
  }
  func.func @transform_7(%arg0: i32) -> (i32, i32) {
    %c0_i32 = arith.constant 0 : i32
    %c0_i32_0 = arith.constant 0 : i32
    %c0_i32_1 = arith.constant 0 : i32
    return %c0_i32, %c0_i32_0 : i32, i32
  }
  func.func @transform_8(%arg0: i32) -> (i32, i32) {
    %c0_i32 = arith.constant 0 : i32
    %c0_i32_0 = arith.constant 0 : i32
    %c0_i32_1 = arith.constant 0 : i32
    return %c0_i32, %c0_i32_0 : i32, i32
  }
  func.func @transform_9(%arg0: i32) -> (i32, i32) {
    %c0_i32 = arith.constant 0 : i32
    %c0_i32_0 = arith.constant 0 : i32
    %c0_i32_1 = arith.constant 0 : i32
    return %c0_i32, %c0_i32_0 : i32, i32
  }
  func.func @transform_10(%arg0: i32) -> (i32, i32) {
    %c0_i32 = arith.constant 0 : i32
    %c0_i32_0 = arith.constant 0 : i32
    %c0_i32_1 = arith.constant 0 : i32
    return %c0_i32, %c0_i32_0 : i32, i32
  }
  func.func @transform_11(%arg0: i32) -> (i32, i32) {
    %c0_i32 = arith.constant 0 : i32
    %c0_i32_0 = arith.constant 0 : i32
    return %c0_i32, %arg0 : i32, i32
  }
}

</mosaic_0001>

<bundles_post_ra>
// kernel: tpu_custom_call.1
= control target key start
LH: loop header
LB: loop body
LE: loop exit
PB: predicated region body
PF: predicated region fallthrough
CT: control target
= control target key end

     0   :  { %vm97_vm0 = vcmask 64512   ;;  %v7665_v5 = vmov 0.0   ;;  %s7651_s0 = inlined_call_operand.vmem [shape: f32[8,256], index: 0, kind: input, shape index: {}]   ;;  %s7652_s1 = inlined_call_operand.vmem [shape: f32[64,8], index: 1, kind: input, shape index: {}]   ;;  %s7653_s2 = inlined_call_operand.vmem [shape: f32[64,1], index: 2, kind: input, shape index: {}]   ;;  %s7654_s3 = inlined_call_operand.vmem [shape: f32[64,64], index: 3, kind: input, shape index: {}]   ;;  %s7655_s4 = inlined_call_operand.vmem [shape: f32[64,1], index: 4, kind: input, shape index: {}]   ;;  %s7656_s5 = inlined_call_operand.vmem [shape: f32[64,64], index: 5, kind: input, shape index: {}]   ;;  %s7657_s6 = inlined_call_operand.vmem [shape: f32[64,1], index: 6, kind: input, shape index: {}]   ;;  %s7658_s7 = inlined_call_operand.vmem [shape: f32[64,64], index: 7, kind: input, shape index: {}]   ;;  %s7659_s8 = inlined_call_operand.vmem [shape: f32[64,1], index: 8, kind: input, shape index: {}]   ;;  %s7660_s9 = inlined_call_operand.vmem [shape: f32[8,64], index: 9, kind: input, shape index: {}]   ;;  %s7661_s10 = inlined_call_operand.vmem [shape: f32[8,1], index: 10, kind: input, shape index: {}]   ;;  %s7662_s11 = inlined_call_operand.hbm [shape: f32[8,256], index: 11, kind: output, shape index: {}]  }
   0x1   :  { %v40_v0 = vld [vmem:[%s7651_s0 + $0x8] sm:$0xff]  ;;  %v39_v1 = vld [vmem:[%s7651_s0] sm:$0xff]  ;;  %351 = vmatprep.mubr.f32.mxu0 %v7665_v5  ;;  %188 = vmatprep.mubr.f32.mxu1 %v7665_v5  ;;  %v43_v11 = vld [vmem:[%s7652_s1 + $0x10] sm:$0xff] }
   0x2   :  { %v41_v2 = vld [vmem:[%s7652_s1] sm:$0xff]  ;;  %v5887_v3 = vand.u32 4294901760, %v40_v0  ;;  %v5889_v4 = vand.u32 4294901760, %v39_v1  ;;  %v42_v6 = vld [vmem:[%s7652_s1 + $0x8] sm:$0xff] }
   0x3   :  { %v99_v7 = vsel %vm97_vm0, %v41_v2, 0  ;;  %v102_v10 = vsel %vm97_vm0, %v42_v6, 0 }
   0x4   :  { %v5898_v8 = vsub.f32 %v40_v0, %v5887_v3  ;;  %v5901_v9 = vsub.f32 %v39_v1, %v5889_v4  ;;  %123 = vmatprep.subr.mxu1 %v5887_v3 }
   0x5   :  { %16 = vsyncpa [#allocation3], 0  ;;  %125 = vmatpush1.msra.mxu1 %v5889_v4  ;;  %v5911_v14 = vand.u32 4294901760, %v99_v7  ;;  %v5913_v15 = vand.u32 4294901760, %v102_v10  ;;  %v105_v16 = vsel %vm97_vm0, %v43_v11, 0  ;;  %v44_v20 = vld [vmem:[%s7652_s1 + $0x18] sm:$0xff] }
   0x6   :  { %v279_v12 = vand.u32 4294901760, %v5898_v8  ;;  %v285_v13 = vand.u32 4294901760, %v5901_v9  ;;  %v5931_v24 = vand.u32 4294901760, %v105_v16  ;;  %v108_v26 = vsel %vm97_vm0, %v44_v20, 0  ;;  %v45_v28 = vld [vmem:[%s7652_s1 + $0x20] sm:$0xff]  ;;  %v46_v36 = vld [vmem:[%s7652_s1 + $0x28] sm:$0xff] }
   0x7   :  { %v5923_v19 = vsub.f32 %v99_v7, %v5911_v14  ;;  %v5929_v21 = vsub.f32 %v102_v10, %v5913_v15  ;;  %v5950_v32 = vand.u32 4294901760, %v108_v26  ;;  %v111_v35 = vsel %vm97_vm0, %v45_v28, 0  ;;  %v47_v43 = vld [vmem:[%s7652_s1 + $0x30] sm:$0xff]  ;;  %v48_v50 = vld [vmem:[%s7652_s1 + $0x38] sm:$0xff]  ;;  %v49_v62 = vld [vmem:[%s7653_s2] sm:$0xff] }
   0x8   :  { %v280_v17 = vsub.f32 %v5898_v8, %v279_v12  ;;  %v286_v18 = vsub.f32 %v5901_v9, %v285_v13  ;;  %v5940_v29 = vsub.f32 %v105_v16, %v5931_v24  ;;  %v5968_v40 = vand.u32 4294901760, %v111_v35  ;;  %v50_v7 = vld [vmem:[%s7653_s2 + $0x8] sm:$0xff]  ;;  %v53_v16 = vld [vmem:[%s7653_s2 + $0x20] sm:$0xff]  ;;  %v55_v20 = vld [vmem:[%s7653_s2 + $0x30] sm:$0xff] }
   0x9   :  { %v191_v25 = vand.u32 4294901760, %v5923_v19  ;;  %v202_v27 = vand.u32 4294901760, %v5929_v21  ;;  %v5961_v37 = vsub.f32 %v108_v26, %v5950_v32  ;;  %v114_v42 = vsel %vm97_vm0, %v46_v36, 0  ;;  %v54_v26 = vld [vmem:[%s7653_s2 + $0x28] sm:$0xff]  ;;  %v956_v28 = vld [vmem:[%s7655_s4 + $0x10] sm:$0xff] }
   0xa   :  { %v281_v22 = vand.u32 4294901760, %v280_v17  ;;  %v287_v23 = vand.u32 4294901760, %v286_v18  ;;  %v213_v33 = vand.u32 4294901760, %v5940_v29  ;;  %v5977_v44 = vsub.f32 %v111_v35, %v5968_v40  ;;  %v51_v18 = vld [vmem:[%s7653_s2 + $0x10] sm:$0xff]  ;;  %v2041_v35 = vld [vmem:[%s7657_s6] sm:$0xff]  ;;  %v959_v36 = vld [vmem:[%s7655_s4 + $0x28] sm:$0xff] }
   0xb   :  { %v192_v30 = vsub.f32 %v5923_v19, %v191_v25  ;;  %v203_v31 = vsub.f32 %v5929_v21, %v202_v27  ;;  %v224_v41 = vand.u32 4294901760, %v5961_v37  ;;  %v5984_v47 = vand.u32 4294901760, %v114_v42 }
   0xc   :  { %282 = vmatprep.subr.mxu0 %v281_v22  ;;  %v214_v39 = vsub.f32 %v5940_v29, %v213_v33  ;;  %v235_v48 = vand.u32 4294901760, %v5977_v44  ;;  %v117_v49 = vsel %vm97_vm0, %v47_v43, 0  ;;  %v120_v56 = vsel %vm97_vm0, %v48_v50, 0  ;;  %v52_v22 = vld [vmem:[%s7653_s2 + $0x18] sm:$0xff]  ;;  %v2042_v43 = vld [vmem:[%s7657_s6 + $0x8] sm:$0xff] }
   0xd   :  { %288 = vmatpush1.msra.mxu0 %v287_v23  ;;  %v193_v34 = vand.u32 4294901760, %v192_v30  ;;  %v204_v38 = vand.u32 4294901760, %v203_v31  ;;  %v225_v46 = vsub.f32 %v5961_v37, %v224_v41  ;;  %v5993_v51 = vsub.f32 %v114_v42, %v5984_v47  ;;  %v954_v23 = vld [vmem:[%s7655_s4] sm:$0xff]  ;;  %v955_v30 = vld [vmem:[%s7655_s4 + $0x8] sm:$0xff]  ;;  %v960_v31 = vld [vmem:[%s7655_s4 + $0x30] sm:$0xff] }
   0xe   :  { %353 = vmatmul.mubr.f32.vlgmr.msra.gmra.mrb[0].mxu0 %v5911_v14  ;;  %410 = vmatprep.subr.mxu0 %v5898_v8  ;;  %v215_v45 = vand.u32 4294901760, %v214_v39  ;;  %v236_v53 = vsub.f32 %v5977_v44, %v235_v48  ;;  %v6000_v54 = vand.u32 4294901760, %v117_v49  ;;  %v6013_v60 = vand.u32 4294901760, %v120_v56  ;;  %v56_v8 = vld [vmem:[%s7653_s2 + $0x38] sm:$0xff]  ;;  %v2045_v42 = vld [vmem:[%s7657_s6 + $0x20] sm:$0xff]  ;;  %v2046_v50 = vld [vmem:[%s7657_s6 + $0x28] sm:$0xff] }
   0xf   :  { %358 = vmatprep.mubr.f32.mxu0 %v7665_v5  ;;  %413 = vmatpush1.msra.mxu0 %v5901_v9  ;;  %v226_v52 = vand.u32 4294901760, %v225_v46  ;;  %v246_v55 = vand.u32 4294901760, %v5993_v51  ;;  %v5816_v63 = vmov 0   ;;  %v961_v39 = vld [vmem:[%s7655_s4 + $0x38] sm:$0xff]  ;;  %v3131_v9 = vld [vmem:[%s7659_s8 + $0x20] sm:$0xff]  ;;  %vm1002_vm1 = vcmask 523264  }
  0x10   :  { %542 = vmatprep.subr.mxu0 %v5887_v3  ;;  %194 = vmatmul.mubr.f32.vlgmr.msra.gmra.mrb[0].mxu1 %v193_v34  ;;  %v6006_v57 = vsub.f32 %v117_v49, %v6000_v54  ;;  %v237_v58 = vand.u32 4294901760, %v236_v53  ;;  %v6021_v0 = vsub.f32 %v120_v56, %v6013_v60  ;;  %v957_v34 = vld [vmem:[%s7655_s4 + $0x18] sm:$0xff]  ;;  %v3127_v49 = vld [vmem:[%s7659_s8] sm:$0xff] }
  0x11   :  { %199 = vmatprep.mubr.f32.mxu1 %v7665_v5  ;;  %v247_v59 = vsub.f32 %v5993_v51, %v246_v55  ;;  %5661 = vset.pattern.permute.xlu0 %v5816_v63  ;;  %v2044_v46 = vld [vmem:[%s7657_s6 + $0x18] sm:$0xff] }
  0x12   :  { %360 = vmatmul.mubr.f32.gmra.mrb[2].mxu0 %v5913_v15  ;;  %v257_v61 = vand.u32 4294901760, %v6006_v57  ;;  %59 = vperm.xlu0 %5661, %v49_v62   ;;  %v268_v6 = vand.u32 4294901760, %v6021_v0  ;;  %v947_v62 = vld [vmem:[%s7654_s3 + $0x8] sm:$0xff] }
  0x13   :  { %365 = vmatprep.mubr.f32.mxu0 %v7665_v5  ;;  %v248_v1 = vand.u32 4294901760, %v247_v59  ;;  %5662 = vset.pattern.permute.xlu1 %v5816_v63 }
  0x14   :  { %205 = vmatmul.mubr.f32.gmra.mrb[2].mxu1 %v204_v38  ;;  %v258_v2 = vsub.f32 %v6006_v57, %v257_v61  ;;  %v269_v11 = vsub.f32 %v6021_v0, %v268_v6  ;;  %69 = vperm.xlu1 %5662, %v51_v18   ;;  %v2043_v38 = vld [vmem:[%s7657_s6 + $0x10] sm:$0xff] }
  0x15   :  { %210 = vmatprep.mubr.f32.mxu1 %v7665_v5 }
  0x16   :  { %367 = vmatmul.mubr.f32.gmra.mrb[4].mxu0 %v5931_v24  ;;  %v259_v10 = vand.u32 4294901760, %v258_v2  ;;  %64 = vperm.xlu0 %5661, %v50_v7   ;;  %v270_v17 = vand.u32 4294901760, %v269_v11 }
  0x17   :  { %372 = vmatprep.mubr.f32.mxu0 %v7665_v5 }
  0x18   :  { %216 = vmatmul.mubr.f32.gmra.mrb[4].mxu1 %v215_v45  ;;  %74 = vperm.xlu1 %5662, %v52_v22   ;;  %v2047_v45 = vld [vmem:[%s7657_s6 + $0x30] sm:$0xff] }
  0x19   :  { %221 = vmatprep.mubr.f32.mxu1 %v7665_v5 }
  0x1a   :  { %374 = vmatmul.mubr.f32.gmra.mrb[6].mxu0 %v5950_v32  ;;  %79 = vperm.xlu0 %5661, %v53_v16   ;;  %v1007_v16 = vsel %vm1002_vm1, %v947_v62, 0 }
  0x1b   :  { %379 = vmatprep.mubr.f32.mxu0 %v7665_v5 }
  0x1c   :  { %227 = vmatmul.mubr.f32.gmra.mrb[6].mxu1 %v226_v52  ;;  %84 = vperm.xlu1 %5662, %v54_v26  }
  0x1d   :  { %232 = vmatprep.mubr.f32.mxu1 %v7665_v5 }
  0x1e   :  { %381 = vmatmul.mubr.f32.gmra.mrb[8].mxu0 %v5968_v40  ;;  %89 = vperm.xlu0 %5661, %v55_v20  }
  0x1f   :  { %386 = vmatprep.mubr.f32.mxu0 %v7665_v5 }
  0x20   :  { %238 = vmatmul.mubr.f32.gmra.mrb[8].mxu1 %v237_v58  ;;  %94 = vperm.xlu1 %5662, %v56_v8  }
  0x21   :  { %243 = vmatprep.mubr.f32.mxu1 %v7665_v5 }
  0x22   :  { %388 = vmatmul.mubr.f32.gmra.mrb[10].mxu0 %v5984_v47  ;;  %964 = vperm.xlu0 %5661, %v954_v23  }
  0x23   :  { %393 = vmatprep.mubr.f32.mxu0 %v7665_v5 }
  0x24   :  { %249 = vmatmul.mubr.f32.gmra.mrb[10].mxu1 %v248_v1  ;;  %969 = vperm.xlu1 %5662, %v955_v30  }
  0x25   :  { %254 = vmatprep.mubr.f32.mxu1 %v7665_v5 }
  0x26   :  { %395 = vmatmul.mubr.f32.gmra.mrb[12].mxu0 %v6000_v54  ;;  %974 = vperm.xlu0 %5661, %v956_v28   ;;  %v6236_v28 = vand.u32 4294901760, %v1007_v16 }
  0x27   :  { %400 = vmatprep.mubr.f32.mxu0 %v7665_v5 }
  0x28   :  { %260 = vmatmul.mubr.f32.gmra.mrb[12].mxu1 %v259_v10  ;;  %979 = vperm.xlu1 %5662, %v957_v34   ;;  %v948_v34 = vld [vmem:[%s7654_s3 + $0x10] sm:$0xff] }
  0x29   :  { %265 = vmatprep.mubr.f32.mxu1 %v7665_v5 }
  0x2a   :  { %402 = vmatmul.mubr.f32.gmra.mrb[14].mxu0 %v6013_v60 }
  0x2b   :  { %476 = vmatprep.mubr.f32.mxu0 %v7665_v5 }
  0x2c   :  { %271 = vmatmul.mubr.f32.gmra.mrb[14].mxu1 %v270_v17  ;;  %989 = vperm.xlu1 %5662, %v959_v36  }
  0x2d   :  { %1107 = vmatprep.mubr.f32.mxu1 %v7665_v5 }
  0x2e   :  { %479 = vmatmul.mubr.f32.vlgmr.msra.gmra.mrb[0].mxu0 %v5923_v19  ;;  %v3129_v19 = vld [vmem:[%s7659_s8 + $0x10] sm:$0xff] }
  0x2f   :  { %484 = vmatprep.mubr.f32.mxu0 %v7665_v5  ;;  %544 = vmatpush1.msra.mxu0 %v5889_v4 }
  0x30   :  { %683 = vmatprep.subr.mxu0 %v279_v12  ;;  %v958_v12 = vld [vmem:[%s7655_s4 + $0x20] sm:$0xff]  ;;  %999 = vperm.xlu1 %5662, %v961_v39  }
  0x31   :  { %984 = vperm.xlu0 %5661, %v958_v12  }
  0x32   :  { %487 = vmatmul.mubr.f32.gmra.mrb[2].mxu0 %v5929_v21  ;;  %v3133_v21 = vld [vmem:[%s7659_s8 + $0x30] sm:$0xff] }
  0x33   :  { %492 = vmatprep.mubr.f32.mxu0 %v7665_v5 }
  0x34   :  { %2056 = vperm.xlu1 %5662, %v2042_v43   ;;  %v6243_v43 = vsub.f32 %v1007_v16, %v6236_v28 }
  0x35   :  { %994 = vperm.xlu0 %5661, %v960_v31  }
  0x36   :  { %495 = vmatmul.mubr.f32.gmra.mrb[4].mxu0 %v5940_v29  ;;  %v3132_v29 = vld [vmem:[%s7659_s8 + $0x28] sm:$0xff] }
  0x37   :  { %500 = vmatprep.mubr.f32.mxu0 %v7665_v5 }
  0x38   :  { %2066 = vperm.xlu1 %5662, %v2044_v46  }
  0x39   :  { %2051 = vperm.xlu0 %5661, %v2041_v35  }
  0x3a   :  { %503 = vmatmul.mubr.f32.gmra.mrb[6].mxu0 %v5961_v37 }
  0x3b   :  { %508 = vmatprep.mubr.f32.mxu0 %v7665_v5 }
  0x3c   :  { %2076 = vperm.xlu1 %5662, %v2046_v50  }
  0x3d   :  { %2061 = vperm.xlu0 %5661, %v2043_v38  }
  0x3e   :  { %511 = vmatmul.mubr.f32.gmra.mrb[8].mxu0 %v5977_v44 }
  0x3f   :  { %516 = vmatprep.mubr.f32.mxu0 %v7665_v5 }
  0x41   :  { %2071 = vperm.xlu0 %5661, %v2045_v42  }
  0x42   :  { %519 = vmatmul.mubr.f32.gmra.mrb[10].mxu0 %v5993_v51 }
  0x43   :  { %524 = vmatprep.mubr.f32.mxu0 %v7665_v5 }
  0x45   :  { %2081 = vperm.xlu0 %5661, %v2047_v45  }
  0x46   :  { %527 = vmatmul.mubr.f32.gmra.mrb[12].mxu0 %v6006_v57  ;;  %v946_v57 = vld [vmem:[%s7654_s3] sm:$0xff] }
  0x47   :  { %532 = vmatprep.mubr.f32.mxu0 %v7665_v5 }
  0x49   :  { %3137 = vperm.xlu0 %5661, %v3127_v49   ;;  %v1010_v49 = vsel %vm1002_vm1, %v948_v34, 0 }
  0x4a   :  { %535 = vmatmul.mubr.f32.gmra.mrb[14].mxu0 %v6021_v0 }
  0x4b   :  { %607 = vmatprep.mubr.f32.mxu0 %v7665_v5 }
  0x4d   :  { %3147 = vperm.xlu0 %5661, %v3129_v19  }
  0x4e   :  { %611 = vmatmul.mubr.f32.vlgmr.msra.gmra.mrb[0].mxu0 %v191_v25  ;;  %v3130_v25 = vld [vmem:[%s7659_s8 + $0x18] sm:$0xff] }
  0x4f   :  { %616 = vmatprep.mubr.f32.mxu0 %v7665_v5  ;;  %687 = vmatpush1.msra.mxu0 %v285_v13  ;;  %v3128_v13 = vld [vmem:[%s7659_s8 + $0x8] sm:$0xff] }
  0x50   :  { %808 = vmatprep.subr.mxu0 %v5887_v3  ;;  %v2048_v3 = vld [vmem:[%s7657_s6 + $0x38] sm:$0xff] }
  0x51   :  { %2086 = vperm.xlu1 %5662, %v2048_v3   ;;  %3157 = vperm.xlu0 %5661, %v3131_v9  }
  0x52   :  { %620 = vmatmul.mubr.f32.gmra.mrb[2].mxu0 %v202_v27  ;;  %v4206_v27 = vld [vmem:[%s7661_s10] sm:$0xff] }
  0x53   :  { %625 = vmatprep.mubr.f32.mxu0 %v7665_v5 }
  0x55   :  { %3142 = vperm.xlu1 %5662, %v3128_v13   ;;  %3167 = vperm.xlu0 %5661, %v3133_v21  }
  0x56   :  { %629 = vmatmul.mubr.f32.gmra.mrb[4].mxu0 %v213_v33  ;;  %v3134_v33 = vld [vmem:[%s7659_s8 + $0x38] sm:$0xff] }
  0x57   :  { %634 = vmatprep.mubr.f32.mxu0 %v7665_v5 }
  0x59   :  { %3152 = vperm.xlu1 %5662, %v3130_v25   ;;  %4209 = vperm.xlu0 %5661, %v4206_v27  }
  0x5a   :  { %638 = vmatmul.mubr.f32.gmra.mrb[6].mxu0 %v224_v41 }
  0x5b   :  { %643 = vmatprep.mubr.f32.mxu0 %v7665_v5 }
  0x5d   :  { %3162 = vperm.xlu1 %5662, %v3132_v29   ;;  %v7663_v29 = vand.u32 4294901760, %v6243_v43 }
  0x5e   :  { %647 = vmatmul.mubr.f32.gmra.mrb[8].mxu0 %v235_v48 }
  0x5f   :  { %652 = vmatprep.mubr.f32.mxu0 %v7665_v5 }
  0x61   :  { %3172 = vperm.xlu1 %5662, %v3134_v33  }
  0x62   :  { %656 = vmatmul.mubr.f32.gmra.mrb[10].mxu0 %v246_v55 }
  0x63   :  { %661 = vmatprep.mubr.f32.mxu0 %v7665_v5 }
  0x66   :  { %665 = vmatmul.mubr.f32.gmra.mrb[12].mxu0 %v257_v61  ;;  %v1004_v61 = vsel %vm1002_vm1, %v946_v57, 0  ;;  %v949_v57 = vld [vmem:[%s7654_s3 + $0x18] sm:$0xff] }
  0x67   :  { %670 = vmatprep.mubr.f32.mxu0 %v7665_v5  ;;  %v6230_v7 = vand.u32 4294901760, %v1004_v61 }
  0x69   :  { %v6234_v26 = vsub.f32 %v1004_v61, %v6230_v7 }
  0x6a   :  { %674 = vmatmul.mubr.f32.gmra.mrb[14].mxu0 %v268_v6 }
  0x6b   :  { %750 = vmatprep.mubr.f32.mxu0 %v7665_v5  ;;  %v7664_v42 = vand.u32 4294901760, %v6234_v26 }
  0x6d   :  { %v6249_v27 = vsub.f32 %v6234_v26, %v7664_v42  ;;  %v950_v42 = vld [vmem:[%s7654_s3 + $0x20] sm:$0xff] }
  0x6e   :  { %752 = vmatmul.mubr.f32.vlgmr.msra.gmra.mrb[0].mxu0 %v5911_v14 }
  0x6f   :  { %757 = vmatprep.mubr.f32.mxu0 %v7665_v5  ;;  %810 = vmatpush1.msra.mxu0 %v5889_v4 }
  0x72   :  { %759 = vmatmul.mubr.f32.gmra.mrb[2].mxu0 %v5913_v15 }
  0x73   :  { %764 = vmatprep.mubr.f32.mxu0 %v7665_v5 }
  0x76   :  { %766 = vmatmul.mubr.f32.gmra.mrb[4].mxu0 %v5931_v24 }
  0x77   :  { %771 = vmatprep.mubr.f32.mxu0 %v7665_v5 }
  0x7a   :  { %773 = vmatmul.mubr.f32.gmra.mrb[6].mxu0 %v5950_v32 }
  0x7b   :  { %778 = vmatprep.mubr.f32.mxu0 %v7665_v5 }
  0x7e   :  { %780 = vmatmul.mubr.f32.gmra.mrb[8].mxu0 %v5968_v40 }
  0x7f   :  { %785 = vmatprep.mubr.f32.mxu0 %v7665_v5 }
  0x82   :  { %787 = vmatmul.mubr.f32.gmra.mrb[10].mxu0 %v5984_v47 }
  0x83   :  { %792 = vmatprep.mubr.f32.mxu0 %v7665_v5 }
  0x86   :  { %794 = vmatmul.mubr.f32.gmra.mrb[12].mxu0 %v6000_v54 }
  0x87   :  { %799 = vmatprep.mubr.f32.mxu0 %v7665_v5 }
  0x8a   :  { %801 = vmatmul.mubr.f32.gmra.mrb[14].mxu0 %v6013_v60 }
  0x8b   :  { %873 = vmatprep.mubr.f32.mxu0 %v7665_v5 }
  0x8e   :  { %875 = vmatmul.mubr.f32.vlgmr.msra.gmra.mrb[0].mxu0 %v5911_v14 }
  0x8f   :  { %880 = vmatprep.mubr.f32.mxu0 %v7665_v5 }
  0x91   :  { %v60_v56 = vpop.permute.xlu0 %59 }
  0x92   :  { %882 = vmatmul.mubr.f32.gmra.mrb[2].mxu0 %v5913_v15 }
  0x93   :  { %887 = vmatprep.mubr.f32.mxu0 %v7665_v5  ;;  %v70_v58 = vpop.permute.xlu1 %69 }
  0x95   :  { %v65_v63 = vpop.permute.xlu0 %64 }
  0x96   :  { %889 = vmatmul.mubr.f32.gmra.mrb[4].mxu0 %v5931_v24 }
  0x97   :  { %894 = vmatprep.mubr.f32.mxu0 %v7665_v5  ;;  %v75_v17 = vpop.permute.xlu1 %74 }
  0x99   :  { %v80_v30 = vpop.permute.xlu0 %79 }
  0x9a   :  { %896 = vmatmul.mubr.f32.gmra.mrb[6].mxu0 %v5950_v32 }
  0x9b   :  { %901 = vmatprep.mubr.f32.mxu0 %v7665_v5  ;;  %v85_v35 = vpop.permute.xlu1 %84 }
  0x9e   :  { %903 = vmatmul.mubr.f32.gmra.mrb[8].mxu0 %v5968_v40 }
  0x9f   :  { %908 = vmatprep.mubr.f32.mxu0 %v7665_v5 }
  0xa2   :  { %910 = vmatmul.mubr.f32.gmra.mrb[10].mxu0 %v5984_v47 }
  0xa3   :  { %915 = vmatprep.mubr.f32.mxu0 %v7665_v5 }
  0xa6   :  { %917 = vmatmul.mubr.f32.gmra.mrb[12].mxu0 %v6000_v54 }
  0xa7   :  { %922 = vmatprep.mubr.f32.mxu0 %v7665_v5 }
  0xaa   :  { %924 = vmatmul.mubr.f32.gmra.mrb[14].mxu0 %v6013_v60 }
  0xab   :  { %2193 = vmatprep.mubr.f32.mxu0 %v7665_v5 }
  0xe3   :  { %v195_v4 = vpop.f32.mrb[0].mxu1 }
  0xe4   :  { %v197_v14 = vpop.f32.mrb[1].mxu1  ;;  %v196_v59 = vadd.f32 %v195_v4, %v60_v56  ;;  %v90_v4 = vpop.permute.xlu0 %89 }
  0xe5   :  { %v198_v60 = vadd.f32 %v197_v14, %v60_v56 }
  0xe7   :  { %v206_v15 = vpop.f32.mrb[2].mxu1 }
  0xe8   :  { %v208_v24 = vpop.f32.mrb[3].mxu1  ;;  %v207_v1 = vadd.f32 %v206_v15, %v65_v63 }
  0xe9   :  { %v209_v10 = vadd.f32 %v208_v24, %v65_v63 }
  0xeb   :  { %v217_v32 = vpop.f32.mrb[4].mxu1 }
  0xec   :  { %v219_v37 = vpop.f32.mrb[5].mxu1  ;;  %v218_v20 = vadd.f32 %v217_v32, %v70_v58  ;;  %v6252_v32 = vand.u32 4294901760, %v1010_v49 }
  0xed   :  { %v220_v8 = vadd.f32 %v219_v37, %v70_v58  ;;  %v95_v37 = vpop.permute.xlu1 %94 }
  0xef   :  { %v228_v40 = vpop.f32.mrb[6].mxu1 }
  0xf0   :  { %v230_v41 = vpop.f32.mrb[7].mxu1  ;;  %v229_v36 = vadd.f32 %v228_v40, %v75_v17 }
  0xf1   :  { %v231_v45 = vadd.f32 %v230_v41, %v75_v17 }
  0xf3   :  { %v239_v44 = vpop.f32.mrb[8].mxu1 }
  0xf4   :  { %v241_v47 = vpop.f32.mrb[9].mxu1  ;;  %v240_v50 = vadd.f32 %v239_v44, %v80_v30 }
  0xf5   :  { %v242_v19 = vadd.f32 %v241_v47, %v80_v30 }
  0xf7   :  { %v250_v48 = vpop.f32.mrb[10].mxu1 }
  0xf8   :  { %v252_v51 = vpop.f32.mrb[11].mxu1  ;;  %v251_v13 = vadd.f32 %v250_v48, %v85_v35 }
  0xf9   :  { %v253_v14 = vadd.f32 %v252_v51, %v85_v35 }
  0xfb   :  { %v6215_v52 = vpop.f32.mrb[12].mxu1 }
  0xfc   :  { %v6217_v53 = vpop.f32.mrb[13].mxu1  ;;  %v262_v40 = vadd.f32 %v6215_v52, %v90_v4 }
  0xfd   :  { %v264_v41 = vadd.f32 %v6217_v53, %v90_v4 }
  0xff   :  { %v6219_v54 = vpop.f32.mrb[14].mxu1 }
 0x100   :  { %v6221_v55 = vpop.f32.mrb[15].mxu1  ;;  %v6257_v47 = vadd.f32 %v6219_v54, %v95_v37  ;;  %v6273_v54 = vsub.f32 %v6243_v43, %v7663_v29 }
 0x101   :  { %v6260_v48 = vadd.f32 %v6221_v55, %v95_v37 }
 0x161   :  { %v876_v0 = vpop.f32.mrb[0].mxu0 }
 0x162   :  { %v5263_v2 = vadd.f32 %v876_v0, %v196_v59  ;;  %v878_v6 = vpop.f32.mrb[1].mxu0  ;;  %v6277_v0 = vsub.f32 %v1010_v49, %v6252_v32 }
 0x163   :  { %v5265_v11 = vadd.f32 %v878_v6, %v198_v60  ;;  %v6281_v6 = vsel %vm1002_vm1, %v949_v57, 0 }
 0x164   :  { %5663 = vtanh.f32 %v5263_v2 }
 0x165   :  { %5665 = vtanh.f32 %v5265_v11  ;;  %v883_v18 = vpop.f32.mrb[2].mxu0 }
 0x166   :  { %v5267_v22 = vadd.f32 %v883_v18, %v207_v1  ;;  %v885_v23 = vpop.f32.mrb[3].mxu0 }
 0x167   :  { %v5269_v12 = vadd.f32 %v885_v23, %v209_v10 }
 0x168   :  { %5667 = vtanh.f32 %v5267_v22 }
 0x169   :  { %5669 = vtanh.f32 %v5269_v12  ;;  %v890_v31 = vpop.f32.mrb[4].mxu0 }
 0x16a   :  { %v5271_v38 = vadd.f32 %v890_v31, %v218_v20  ;;  %v892_v39 = vpop.f32.mrb[5].mxu0 }
 0x16b   :  { %v5273_v46 = vadd.f32 %v892_v39, %v220_v8 }
 0x16c   :  { %5671 = vtanh.f32 %v5271_v38 }
 0x16d   :  { %5673 = vtanh.f32 %v5273_v46  ;;  %v897_v3 = vpop.f32.mrb[6].mxu0 }
 0x16e   :  { %v5664_v9 = vpop.eup %5663  ;;  %v5275_v21 = vadd.f32 %v897_v3, %v229_v36  ;;  %v899_v25 = vpop.f32.mrb[7].mxu0 }
 0x16f   :  { %v5666_v33 = vpop.eup %5665  ;;  %v5277_v15 = vadd.f32 %v899_v25, %v231_v45  ;;  %v1029_v24 = vand.u32 4294901760, %v5664_v9 }
 0x170   :  { %5675 = vtanh.f32 %v5275_v21  ;;  %v1027_v44 = vand.u32 4294901760, %v5666_v33 }
 0x171   :  { %5677 = vtanh.f32 %v5277_v15  ;;  %v904_v56 = vpop.f32.mrb[8].mxu0  ;;  %v6262_v51 = vsub.f32 %v5664_v9, %v1029_v24 }
 0x172   :  { %v5668_v58 = vpop.eup %5667  ;;  %v5279_v52 = vadd.f32 %v904_v56, %v240_v50  ;;  %v906_v59 = vpop.f32.mrb[9].mxu0  ;;  %v6267_v53 = vsub.f32 %v5666_v33, %v1027_v44 }
 0x173   :  { %v5670_v55 = vpop.eup %5669  ;;  %v5281_v61 = vadd.f32 %v906_v59, %v242_v19  ;;  %v1033_v62 = vand.u32 4294901760, %v5668_v58  ;;  %v1204_v63 = vand.u32 4294901760, %v6262_v51 }
 0x174   :  { %5679 = vtanh.f32 %v5279_v52  ;;  %v1031_v1 = vand.u32 4294901760, %v5670_v55  ;;  %v1198_v2 = vand.u32 4294901760, %v6267_v53 }
 0x175   :  { %5681 = vtanh.f32 %v5281_v61  ;;  %v911_v10 = vpop.f32.mrb[10].mxu0  ;;  %v6283_v11 = vpack.c.bf16 %v1033_v62, %v1029_v24  ;;  %v6285_v16 = vsub.f32 %v5668_v58, %v1033_v62  ;;  %v1205_v17 = vsub.f32 %v6262_v51, %v1204_v63 }
 0x176   :  { %v5672_v18 = vpop.eup %5671  ;;  %v5283_v20 = vadd.f32 %v911_v10, %v251_v13  ;;  %v913_v22 = vpop.f32.mrb[11].mxu0  ;;  %v6290_v23 = vpack.c.bf16 %v1031_v1, %v1027_v44  ;;  %v6292_v8 = vsub.f32 %v5670_v55, %v1031_v1  ;;  %v1199_v12 = vsub.f32 %v6267_v53, %v1198_v2 }
 0x177   :  { %v5674_v30 = vpop.eup %5673  ;;  %v5285_v31 = vadd.f32 %v913_v22, %v253_v14  ;;  %v1037_v34 = vand.u32 4294901760, %v5672_v18  ;;  %v1206_v35 = vand.u32 4294901760, %v1205_v17  ;;  %v1216_v36 = vand.u32 4294901760, %v6285_v16 }
 0x178   :  { %5683 = vtanh.f32 %v5283_v20  ;;  %4879 = vmatprep.subr.bf16.mxu1 %v6290_v23  ;;  %v1035_v38 = vand.u32 4294901760, %v5674_v30  ;;  %v1200_v39 = vand.u32 4294901760, %v1199_v12  ;;  %v1210_v45 = vand.u32 4294901760, %v6292_v8 }
 0x179   :  { %5685 = vtanh.f32 %v5285_v31  ;;  %v918_v46 = vpop.f32.mrb[12].mxu0  ;;  %4881 = vmatpush1.bf16.msra.mxu1 %v6283_v11  ;;  %v6301_v49 = vsub.f32 %v5672_v18, %v1037_v34  ;;  %v1217_v50 = vsub.f32 %v6285_v16, %v1216_v36 }
 0x17a   :  { %v5676_v3 = vpop.eup %5675  ;;  %v5287_v9 = vadd.f32 %v918_v46, %v262_v40  ;;  %v920_v13 = vpop.f32.mrb[13].mxu0  ;;  %v6308_v21 = vsub.f32 %v5674_v30, %v1035_v38  ;;  %v1211_v25 = vsub.f32 %v6292_v8, %v1210_v45 }
 0x17b   :  { %v5678_v4 = vpop.eup %5677  ;;  %v5289_v14 = vadd.f32 %v920_v13, %v264_v41  ;;  %v1041_v15 = vand.u32 4294901760, %v5676_v3  ;;  %v1218_v24 = vand.u32 4294901760, %v1217_v50  ;;  %v1228_v37 = vand.u32 4294901760, %v6301_v49 }
 0x17c   :  { %5687 = vtanh.f32 %v5287_v9  ;;  %v1039_v44 = vand.u32 4294901760, %v5678_v4  ;;  %v1212_v56 = vand.u32 4294901760, %v1211_v25  ;;  %v1222_v57 = vand.u32 4294901760, %v6308_v21 }
 0x17d   :  { %5689 = vtanh.f32 %v5289_v14  ;;  %v925_v40 = vpop.f32.mrb[14].mxu0  ;;  %v6315_v58 = vpack.c.bf16 %v1041_v15, %v1037_v34  ;;  %v6317_v52 = vsub.f32 %v5676_v3, %v1041_v15  ;;  %v6319_v59 = vpack.c.bf16 %v1218_v24, %v1206_v35 }
 0x17e   :  { %v5680_v55 = vpop.eup %5679  ;;  %v5291_v41 = vadd.f32 %v925_v40, %v6257_v47  ;;  %v927_v61 = vpop.f32.mrb[15].mxu0  ;;  %v6322_v62 = vpack.c.bf16 %v1039_v44, %v1035_v38  ;;  %v6324_v1 = vsub.f32 %v5678_v4, %v1039_v44  ;;  %v6326_v10 = vpack.c.bf16 %v1212_v56, %v1200_v39 }
 0x17f   :  { %v5682_v17 = vpop.eup %5681  ;;  %v5293_v18 = vadd.f32 %v927_v61, %v6260_v48  ;;  %v1045_v20 = vand.u32 4294901760, %v5680_v55  ;;  %v1223_v22 = vsub.f32 %v6308_v21, %v1222_v57  ;;  %v1229_v12 = vsub.f32 %v6301_v49, %v1228_v37 }
 0x180   :  { %5691 = vtanh.f32 %v5291_v41  ;;  %4883 = vmatprep.subr.bf16.mxu1 %v6322_v62  ;;  %v1043_v47 = vand.u32 4294901760, %v5682_v17  ;;  %v1234_v30 = vand.u32 4294901760, %v6324_v1  ;;  %v1240_v31 = vand.u32 4294901760, %v6317_v52 }
 0x181   :  { %5693 = vtanh.f32 %v5293_v18  ;;  %4885 = vmatpush1.bf16.msra.mxu1 %v6315_v58  ;;  %v6339_v48 = vsub.f32 %v5680_v55, %v1045_v20  ;;  %v1224_v34 = vand.u32 4294901760, %v1223_v22  ;;  %v1230_v35 = vand.u32 4294901760, %v1229_v12 }
 0x182   :  { %v5684_v38 = vpop.eup %5683  ;;  %v6341_v39 = vsub.f32 %v5682_v17, %v1043_v47  ;;  %v1235_v46 = vsub.f32 %v6324_v1, %v1234_v30  ;;  %v1241_v50 = vsub.f32 %v6317_v52, %v1240_v31  ;;  %v6352_v14 = vpack.c.bf16 %v1210_v45, %v1198_v2 }
 0x183   :  { %v5686_v9 = vpop.eup %5685  ;;  %v1049_v13 = vand.u32 4294901760, %v5684_v38  ;;  %v1252_v25 = vand.u32 4294901760, %v6339_v48  ;;  %v6364_v61 = vpack.c.bf16 %v1216_v36, %v1204_v63 }
 0x184   :  { %v1047_v15 = vand.u32 4294901760, %v5686_v9  ;;  %v1236_v24 = vand.u32 4294901760, %v1235_v46  ;;  %v1242_v44 = vand.u32 4294901760, %v1241_v50  ;;  %v1246_v56 = vand.u32 4294901760, %v6341_v39 }
 0x185   :  { %v6355_v40 = vpack.c.bf16 %v1049_v13, %v1045_v20  ;;  %v6357_v55 = vsub.f32 %v5684_v38, %v1049_v13  ;;  %v1253_v41 = vsub.f32 %v6339_v48, %v1252_v25  ;;  %v6377_v50 = vand.u32 4294901760, %v6281_v6 }
 0x186   :  { %v5688_v17 = vpop.eup %5687  ;;  %v6366_v2 = vpack.c.bf16 %v1047_v15, %v1043_v47  ;;  %v6368_v45 = vsub.f32 %v5686_v9, %v1047_v15  ;;  %v6370_v18 = vpack.c.bf16 %v1236_v24, %v1224_v34  ;;  %v6372_v22 = vpack.c.bf16 %v1242_v44, %v1230_v35 }
 0x187   :  { %v5690_v20 = vpop.eup %5689  ;;  %v1053_v12 = vand.u32 4294901760, %v5688_v17  ;;  %v1247_v38 = vsub.f32 %v6341_v39, %v1246_v56  ;;  %v1264_v46 = vand.u32 4294901760, %v6357_v55  ;;  %v1254_v9 = vand.u32 4294901760, %v1253_v41 }
 0x188   :  { %4887 = vmatprep.subr.bf16.mxu1 %v6366_v2  ;;  %v1051_v63 = vand.u32 4294901760, %v5690_v20  ;;  %v1258_v36 = vand.u32 4294901760, %v6368_v45  ;;  %v6391_v15 = vpack.c.bf16 %v1234_v30, %v1222_v57 }
 0x189   :  { %4889 = vmatpush1.bf16.msra.mxu1 %v6355_v40  ;;  %v6386_v35 = vsub.f32 %v5688_v17, %v1053_v12  ;;  %v1265_v13 = vsub.f32 %v6357_v55, %v1264_v46  ;;  %v6401_v17 = vpack.c.bf16 %v1240_v31, %v1228_v37  ;;  %v6406_v30 = vpack.c.bf16 %v1264_v46, %v1252_v25 }
 0x18a   :  { %v5692_v24 = vpop.eup %5691  ;;  %v6393_v44 = vsub.f32 %v5690_v20, %v1051_v63  ;;  %v1259_v29 = vsub.f32 %v6368_v45, %v1258_v36  ;;  %v6403_v41 = vpack.c.bf16 %v1258_v36, %v1246_v56  ;;  %v1248_v3 = vand.u32 4294901760, %v1247_v38 }
 0x18b   :  { %v5694_v34 = vpop.eup %5693  ;;  %v1057_v47 = vand.u32 4294901760, %v5692_v24  ;;  %v1266_v4 = vand.u32 4294901760, %v1265_v13  ;;  %v1276_v57 = vand.u32 4294901760, %v6386_v35  ;;  %7673 = vst [vmem:[#allocation6_spill] sm:$0xff] %v6406_v30  ;;  %v1016_v31 = vsel %vm1002_vm1, %v950_v42, 0 }
 0x18c   :  { %7672 = vst [vmem:[#allocation5_spill] sm:$0xff] %v6403_v41  ;;  %v1055_v20 = vand.u32 4294901760, %v5694_v34  ;;  %v1260_v33 = vand.u32 4294901760, %v1259_v29  ;;  %v1270_v19 = vand.u32 4294901760, %v6393_v44  ;;  %v7667_v25 = vand.u32 4294901760, %v6277_v0  ;;  %v951_v29 = vld [vmem:[%s7654_s3 + $0x28] sm:$0xff] }
 0x18d   :  { %v6409_v5 = vpack.c.bf16 %v1057_v47, %v1053_v12  ;;  %v6411_v60 = vsub.f32 %v5692_v24, %v1057_v47  ;;  %v4904_v37 = vpack.c.bf16 %v1266_v4, %v1254_v9  ;;  %v6424_v12 = vsub.f32 %v6281_v6, %v6377_v50 }
 0x18e   :  { %v6414_v56 = vpack.c.bf16 %v1055_v20, %v1051_v63  ;;  %v6416_v36 = vsub.f32 %v5694_v34, %v1055_v20  ;;  %v4902_v13 = vpack.c.bf16 %v1260_v33, %v1248_v3  ;;  %v1277_v38 = vsub.f32 %v6386_v35, %v1276_v57  ;;  %v952_v20 = vld [vmem:[%s7654_s3 + $0x30] sm:$0xff] }
 0x18f   :  { %v1288_v4 = vand.u32 4294901760, %v6411_v60  ;;  %v1271_v33 = vsub.f32 %v6393_v44, %v1270_v19  ;;  %v6433_v46 = vand.u32 4294901760, %v1016_v31  ;;  %v1019_v47 = vsel %vm1002_vm1, %v951_v29, 0 }
 0x190   :  { %4891 = vmatprep.subr.bf16.mxu1 %v6414_v56  ;;  %v1282_v3 = vand.u32 4294901760, %v6416_v36  ;;  %v1123_v9 = vand.u32 4294901760, %v6273_v54  ;;  %v1133_v63 = vsub.f32 %v6277_v0, %v7667_v25  ;;  %v1143_v29 = vand.u32 4294901760, %v6424_v12 }
 0x191   :  { %4893 = vmatpush1.bf16.msra.mxu1 %v6409_v5  ;;  %v1289_v6 = vsub.f32 %v6411_v60, %v1288_v4  ;;  %v6440_v34 = vpack.c.bf16 %v1288_v4, %v1276_v57  ;;  %v1278_v57 = vand.u32 4294901760, %v1277_v38  ;;  %v1272_v54 = vand.u32 4294901760, %v1271_v33 }
 0x192   :  { %4895 = vmatprep.subr.bf16.mxu1 %v6326_v10  ;;  %v1283_v24 = vsub.f32 %v6416_v36, %v1282_v3  ;;  %v6448_v42 = vpack.c.bf16 %v1282_v3, %v1270_v19  ;;  %v7675_v10 = vand.u32 4294901760, %v6249_v27  ;;  %v6457_v30 = vsub.f32 %v1016_v31, %v6433_v46  ;;  %v953_v27 = vld [vmem:[%s7654_s3 + $0x38] sm:$0xff] }
 0x193   :  { %7674 = vst [vmem:[#allocation7_spill] sm:$0xff] %v6440_v34  ;;  %v1290_v4 = vand.u32 4294901760, %v1289_v6  ;;  %v6459_v41 = vand.u32 4294901760, %v1019_v47  ;;  %v7676_v19 = vmov 0.0   ;;  %v1022_v25 = vsel %vm1002_vm1, %v952_v20, 0 }
 0x194   :  { %1113 = vmatmul.mubr.f32.vlgmr.msra.gmra.mrb[16].mxu1 %v7675_v10  ;;  %v1284_v34 = vand.u32 4294901760, %v1283_v24  ;;  %v1144_v31 = vsub.f32 %v6424_v12, %v1143_v29  ;;  %v1134_v33 = vand.u32 4294901760, %v1133_v63  ;;  %v6475_v24 = vand.u32 4294901760, %v1022_v25 }
 0x195   :  { %4897 = vmatpush1.bf16.msra.mxu1 %v6319_v59  ;;  %1118 = vmatprep.mubr.f32.mxu1 %v7676_v19  ;;  %v4908_v3 = vpack.c.bf16 %v1290_v4, %v1278_v57  ;;  %v1154_v59 = vand.u32 4294901760, %v6457_v30  ;;  %v6473_v6 = vsub.f32 %v1019_v47, %v6459_v41 }
 0x196   :  { %4899 = vmatprep.subr.bf16.mxu1 %v6370_v18  ;;  %v4906_v38 = vpack.c.bf16 %v1284_v34, %v1272_v54  ;;  %v1025_v18 = vsel %vm1002_vm1, %v953_v27, 0  ;;  %v1145_v34 = vand.u32 4294901760, %v1144_v31  ;;  %v6485_v47 = vsub.f32 %v1022_v25, %v6475_v24 }
 0x197   :  { %v1155_v63 = vsub.f32 %v6457_v30, %v1154_v59  ;;  %v6487_v20 = vand.u32 4294901760, %v1025_v18  ;;  %v7679_v27 = vpack.c.bf16 %v6324_v1, %v6308_v21  ;;  %v7680_v31 = vpack.c.bf16 %v6317_v52, %v6301_v49  ;;  %v7687_v52 = vld [vmem:[#allocation5_spill] sm:$0xff] }
 0x198   :  { %1124 = vmatmul.mubr.f32.gmra.mrb[18].mxu1 %v1123_v9  ;;  %v1165_v9 = vand.u32 4294901760, %v6473_v6  ;;  %v1176_v57 = vand.u32 4294901760, %v6485_v47  ;;  %v7684_v49 = vpack.c.bf16 %v6411_v60, %v6386_v35  ;;  %v7685_v60 = vand.u32 4294901760, %v6234_v26 }
 0x199   :  { %4901 = vmatpush1.bf16.msra.mxu1 %v6372_v22  ;;  %1129 = vmatprep.mubr.f32.mxu1 %v7676_v19  ;;  %v1156_v22 = vand.u32 4294901760, %v1155_v63  ;;  %v6495_v4 = vsub.f32 %v1025_v18, %v6487_v20  ;;  %v7686_v21 = vand.u32 4294901760, %v6243_v43  ;;  %v7688_v1 = vand.u32 4294901760, %v6277_v0 }
 0x19a   :  { %4903 = vmatprep.subr.bf16.mxu1 %v4902_v13  ;;  %v1166_v13 = vsub.f32 %v6473_v6, %v1165_v9  ;;  %v1177_v10 = vsub.f32 %v6485_v47, %v1176_v57 }
 0x19b   :  { %v1187_v54 = vand.u32 4294901760, %v6495_v4 }
 0x19c   :  { %1135 = vmatmul.mubr.f32.gmra.mrb[20].mxu1 %v1134_v33  ;;  %v1167_v25 = vand.u32 4294901760, %v1166_v13  ;;  %v7681_v33 = vpack.c.bf16 %v6368_v45, %v6341_v39  ;;  %v970_v39 = vpop.permute.xlu1 %969 }
 0x19d   :  { %4905 = vmatpush1.bf16.msra.mxu1 %v4904_v37  ;;  %1140 = vmatprep.mubr.f32.mxu1 %v7676_v19  ;;  %v7677_v37 = vpack.c.bf16 %v6292_v8, %v6267_v53  ;;  %v7678_v8 = vpack.c.bf16 %v6285_v16, %v6262_v51  ;;  %v7682_v51 = vpack.c.bf16 %v6357_v55, %v6339_v48 }
 0x19e   :  { %4907 = vmatprep.subr.bf16.mxu1 %v4906_v38  ;;  %v1178_v38 = vand.u32 4294901760, %v1177_v10  ;;  %v7683_v16 = vpack.c.bf16 %v6416_v36, %v6393_v44 }
 0x1a0   :  { %1146 = vmatmul.mubr.f32.gmra.mrb[22].mxu1 %v1145_v34 }
 0x1a1   :  { %4909 = vmatpush1.bf16.msra.mxu1 %v4908_v3  ;;  %1151 = vmatprep.mubr.f32.mxu1 %v7676_v19  ;;  %v1188_v3 = vsub.f32 %v6495_v4, %v1187_v54 }
 0x1a2   :  { %4911 = vmatprep.subr.bf16.mxu1 %v7677_v37 }
 0x1a3   :  { %v1189_v53 = vand.u32 4294901760, %v1188_v3 }
 0x1a4   :  { %1157 = vmatmul.mubr.f32.gmra.mrb[24].mxu1 %v1156_v22 }
 0x1a5   :  { %1162 = vmatprep.mubr.f32.mxu1 %v7676_v19 }
 0x1a8   :  { %1168 = vmatmul.mubr.f32.gmra.mrb[26].mxu1 %v1167_v25 }
 0x1a9   :  { %1173 = vmatprep.mubr.f32.mxu1 %v7676_v19 }
 0x1ac   :  { %1179 = vmatmul.mubr.f32.gmra.mrb[28].mxu1 %v1178_v38 }
 0x1ad   :  { %1184 = vmatprep.mubr.f32.mxu1 %v7676_v19 }
 0x1b0   :  { %1190 = vmatmul.mubr.f32.gmra.mrb[30].mxu1 %v1189_v53 }
 0x1b1   :  { %1340 = vmatprep.mubr.f32.mxu1 %v7676_v19 }
 0x1b4   :  { %1342 = vmatmul.mubr.f32.vlgmr.msra.gmra.mrb[16].mxu1 %v6230_v7 }
 0x1b5   :  { %4913 = vmatpush1.bf16.msra.mxu1 %v7678_v8  ;;  %1347 = vmatprep.mubr.f32.mxu1 %v7676_v19 }
 0x1b6   :  { %4915 = vmatprep.subr.bf16.mxu1 %v7679_v27 }
 0x1b8   :  { %1349 = vmatmul.mubr.f32.gmra.mrb[18].mxu1 %v6236_v28 }
 0x1b9   :  { %4917 = vmatpush1.bf16.msra.mxu1 %v7680_v31  ;;  %1354 = vmatprep.mubr.f32.mxu1 %v7676_v19 }
 0x1ba   :  { %4919 = vmatprep.subr.bf16.mxu1 %v7681_v33 }
 0x1bc   :  { %1356 = vmatmul.mubr.f32.gmra.mrb[20].mxu1 %v6252_v32 }
 0x1bd   :  { %4921 = vmatpush1.bf16.msra.mxu1 %v7682_v51  ;;  %1361 = vmatprep.mubr.f32.mxu1 %v7676_v19 }
 0x1be   :  { %4923 = vmatprep.subr.bf16.mxu1 %v7683_v16 }
 0x1c0   :  { %1363 = vmatmul.mubr.f32.gmra.mrb[22].mxu1 %v6377_v50 }
 0x1c1   :  { %4925 = vmatpush1.bf16.msra.mxu1 %v7684_v49  ;;  %1368 = vmatprep.mubr.f32.mxu1 %v7676_v19 }
 0x1c2   :  { %4927 = vmatprep.subr.bf16.mxu1 %v6290_v23 }
 0x1c4   :  { %1370 = vmatmul.mubr.f32.gmra.mrb[24].mxu1 %v6433_v46 }
 0x1c5   :  { %1375 = vmatprep.mubr.f32.mxu1 %v7676_v19 }
 0x1c8   :  { %1377 = vmatmul.mubr.f32.gmra.mrb[26].mxu1 %v6459_v41 }
 0x1c9   :  { %1382 = vmatprep.mubr.f32.mxu1 %v7676_v19 }
 0x1cc   :  { %1384 = vmatmul.mubr.f32.gmra.mrb[28].mxu1 %v6475_v24 }
 0x1cd   :  { %1389 = vmatprep.mubr.f32.mxu1 %v7676_v19 }
 0x1d0   :  { %1391 = vmatmul.mubr.f32.gmra.mrb[30].mxu1 %v6487_v20 }
 0x1d1   :  { %1493 = vmatprep.mubr.f32.mxu1 %v7676_v19 }
 0x1d4   :  { %1496 = vmatmul.mubr.f32.vlgmr.msra.gmra.mrb[16].mxu1 %v6234_v26  ;;  %v7689_v26 = vld [vmem:[#allocation6_spill] sm:$0xff] }
 0x1d5   :  { %4929 = vmatpush1.bf16.msra.mxu1 %v6283_v11  ;;  %1501 = vmatprep.mubr.f32.mxu1 %v7676_v19 }
 0x1d6   :  { %4931 = vmatprep.subr.bf16.mxu1 %v6322_v62 }
 0x1d8   :  { %1504 = vmatmul.mubr.f32.gmra.mrb[18].mxu1 %v6243_v43  ;;  %v7690_v43 = vld [vmem:[#allocation7_spill] sm:$0xff] }
 0x1d9   :  { %4933 = vmatpush1.bf16.msra.mxu1 %v6315_v58  ;;  %1509 = vmatprep.mubr.f32.mxu1 %v7676_v19 }
 0x1da   :  { %4935 = vmatprep.subr.bf16.mxu1 %v6366_v2 }
 0x1dc   :  { %1512 = vmatmul.mubr.f32.gmra.mrb[20].mxu1 %v6277_v0 }
 0x1dd   :  { %4937 = vmatpush1.bf16.msra.mxu1 %v6355_v40  ;;  %1517 = vmatprep.mubr.f32.mxu1 %v7676_v19 }
 0x1de   :  { %4939 = vmatprep.subr.bf16.mxu1 %v6414_v56 }
 0x1e0   :  { %1520 = vmatmul.mubr.f32.gmra.mrb[22].mxu1 %v6424_v12  ;;  %v980_v12 = vpop.permute.xlu1 %979 }
 0x1e1   :  { %4941 = vmatpush1.bf16.msra.mxu1 %v6409_v5  ;;  %1525 = vmatprep.mubr.f32.mxu1 %v7676_v19 }
 0x1e2   :  { %4943 = vmatprep.subr.bf16.mxu1 %v6352_v14 }
 0x1e4   :  { %1528 = vmatmul.mubr.f32.gmra.mrb[24].mxu1 %v6457_v30  ;;  %v990_v49 = vpop.permute.xlu1 %989 }
 0x1e5   :  { %1533 = vmatprep.mubr.f32.mxu1 %v7676_v19 }
 0x1e8   :  { %1536 = vmatmul.mubr.f32.gmra.mrb[26].mxu1 %v6473_v6 }
 0x1e9   :  { %1541 = vmatprep.mubr.f32.mxu1 %v7676_v19 }
 0x1ec   :  { %1544 = vmatmul.mubr.f32.gmra.mrb[28].mxu1 %v6485_v47 }
 0x1ed   :  { %1549 = vmatprep.mubr.f32.mxu1 %v7676_v19 }
 0x1f0   :  { %1552 = vmatmul.mubr.f32.gmra.mrb[30].mxu1 %v6495_v4 }
 0x1f1   :  { %1638 = vmatprep.mubr.f32.mxu1 %v7676_v19 }
 0x1f4   :  { %1642 = vmatmul.mubr.f32.vlgmr.msra.gmra.mrb[16].mxu1 %v7685_v60 }
 0x1f5   :  { %4945 = vmatpush1.bf16.msra.mxu1 %v6364_v61  ;;  %1647 = vmatprep.mubr.f32.mxu1 %v7676_v19 }
 0x1f6   :  { %4947 = vmatprep.subr.bf16.mxu1 %v6391_v15  ;;  %v2035_v15 = vld [vmem:[%s7656_s5 + $0x10] sm:$0xff] }
 0x1f7   :  { %v2096_v36 = vsel %vm1002_vm1, %v2035_v15, 0 }
 0x1f8   :  { %1651 = vmatmul.mubr.f32.gmra.mrb[18].mxu1 %v7686_v21 }
 0x1f9   :  { %4949 = vmatpush1.bf16.msra.mxu1 %v6401_v17  ;;  %1656 = vmatprep.mubr.f32.mxu1 %v7676_v19 }
 0x1fa   :  { %4951 = vmatprep.subr.bf16.mxu1 %v7687_v52 }
 0x1fc   :  { %1660 = vmatmul.mubr.f32.gmra.mrb[20].mxu1 %v7688_v1 }
 0x1fd   :  { %4953 = vmatpush1.bf16.msra.mxu1 %v7689_v26  ;;  %1665 = vmatprep.mubr.f32.mxu1 %v7676_v19 }
 0x1fe   :  { %4955 = vmatprep.subr.bf16.mxu1 %v6448_v42 }
 0x200   :  { %1669 = vmatmul.mubr.f32.gmra.mrb[22].mxu1 %v1143_v29 }
 0x201   :  { %4957 = vmatpush1.bf16.msra.mxu1 %v7690_v43  ;;  %1674 = vmatprep.mubr.f32.mxu1 %v7676_v19 }
 0x202   :  { %4959 = vmatprep.subr.bf16.mxu1 %v6290_v23 }
 0x204   :  { %1678 = vmatmul.mubr.f32.gmra.mrb[24].mxu1 %v1154_v59 }
 0x205   :  { %1683 = vmatprep.mubr.f32.mxu1 %v7676_v19 }
 0x208   :  { %1687 = vmatmul.mubr.f32.gmra.mrb[26].mxu1 %v1165_v9  ;;  %v6674_v9 = vand.u32 4294901760, %v2096_v36 }
 0x209   :  { %1692 = vmatprep.mubr.f32.mxu1 %v7676_v19 }
 0x20a   :  { %v6691_v31 = vsub.f32 %v2096_v36, %v6674_v9 }
 0x20c   :  { %1696 = vmatmul.mubr.f32.gmra.mrb[28].mxu1 %v1176_v57  ;;  %v2036_v57 = vld [vmem:[%s7656_s5 + $0x18] sm:$0xff] }
 0x20d   :  { %1701 = vmatprep.mubr.f32.mxu1 %v7676_v19  ;;  %v6695_v16 = vsel %vm1002_vm1, %v2036_v57, 0 }
 0x210   :  { %1705 = vmatmul.mubr.f32.gmra.mrb[30].mxu1 %v1187_v54 }
 0x211   :  { %1823 = vmatprep.mubr.f32.mxu1 %v7676_v19 }
 0x214   :  { %1825 = vmatmul.mubr.f32.vlgmr.msra.gmra.mrb[16].mxu1 %v6230_v7 }
 0x215   :  { %4961 = vmatpush1.bf16.msra.mxu1 %v6283_v11  ;;  %1830 = vmatprep.mubr.f32.mxu1 %v7676_v19 }
 0x216   :  { %4963 = vmatprep.subr.bf16.mxu1 %v6322_v62 }
 0x218   :  { %1832 = vmatmul.mubr.f32.gmra.mrb[18].mxu1 %v6236_v28 }
 0x219   :  { %4965 = vmatpush1.bf16.msra.mxu1 %v6315_v58  ;;  %1837 = vmatprep.mubr.f32.mxu1 %v7676_v19 }
 0x21a   :  { %4967 = vmatprep.subr.bf16.mxu1 %v6366_v2 }
 0x21c   :  { %1839 = vmatmul.mubr.f32.gmra.mrb[20].mxu1 %v6252_v32 }
 0x21d   :  { %4969 = vmatpush1.bf16.msra.mxu1 %v6355_v40  ;;  %1844 = vmatprep.mubr.f32.mxu1 %v7676_v19 }
 0x21e   :  { %4971 = vmatprep.subr.bf16.mxu1 %v6414_v56 }
 0x220   :  { %1846 = vmatmul.mubr.f32.gmra.mrb[22].mxu1 %v6377_v50 }
 0x221   :  { %4973 = vmatpush1.bf16.msra.mxu1 %v6409_v5  ;;  %1851 = vmatprep.mubr.f32.mxu1 %v7676_v19  ;;  %v2033_v5 = vld [vmem:[%s7656_s5] sm:$0xff] }
 0x224   :  { %1853 = vmatmul.mubr.f32.gmra.mrb[24].mxu1 %v6433_v46 }
 0x225   :  { %1858 = vmatprep.mubr.f32.mxu1 %v7676_v19 }
 0x228   :  { %1860 = vmatmul.mubr.f32.gmra.mrb[26].mxu1 %v6459_v41 }
 0x229   :  { %1865 = vmatprep.mubr.f32.mxu1 %v7676_v19 }
 0x22c   :  { %1867 = vmatmul.mubr.f32.gmra.mrb[28].mxu1 %v6475_v24 }
 0x22d   :  { %1872 = vmatprep.mubr.f32.mxu1 %v7676_v19 }
 0x230   :  { %1874 = vmatmul.mubr.f32.gmra.mrb[30].mxu1 %v6487_v20 }
 0x231   :  { %1960 = vmatprep.mubr.f32.mxu1 %v7676_v19 }
 0x234   :  { %1962 = vmatmul.mubr.f32.vlgmr.msra.gmra.mrb[16].mxu1 %v6230_v7  ;;  %v2090_v7 = vsel %vm1002_vm1, %v2033_v5, 0 }
 0x235   :  { %1967 = vmatprep.mubr.f32.mxu1 %v7676_v19  ;;  %v6652_v58 = vand.u32 4294901760, %v2090_v7 }
 0x237   :  { %v6656_v61 = vsub.f32 %v2090_v7, %v6652_v58 }
 0x238   :  { %1969 = vmatmul.mubr.f32.gmra.mrb[18].mxu1 %v6236_v28  ;;  %v2034_v28 = vld [vmem:[%s7656_s5 + $0x8] sm:$0xff] }
 0x239   :  { %1974 = vmatprep.mubr.f32.mxu1 %v7676_v19  ;;  %v2093_v48 = vsel %vm1002_vm1, %v2034_v28, 0 }
 0x23a   :  { %v6658_v2 = vand.u32 4294901760, %v2093_v48 }
 0x23c   :  { %1976 = vmatmul.mubr.f32.gmra.mrb[20].mxu1 %v6252_v32  ;;  %v965_v32 = vpop.permute.xlu0 %964  ;;  %v6665_v30 = vsub.f32 %v2093_v48, %v6658_v2 }
 0x23d   :  { %1981 = vmatprep.mubr.f32.mxu1 %v7676_v19 }
 0x240   :  { %1983 = vmatmul.mubr.f32.gmra.mrb[22].mxu1 %v6377_v50  ;;  %v975_v50 = vpop.permute.xlu0 %974 }
 0x241   :  { %1988 = vmatprep.mubr.f32.mxu1 %v7676_v19 }
 0x244   :  { %1990 = vmatmul.mubr.f32.gmra.mrb[24].mxu1 %v6433_v46 }
 0x245   :  { %1995 = vmatprep.mubr.f32.mxu1 %v7676_v19 }
 0x248   :  { %1997 = vmatmul.mubr.f32.gmra.mrb[26].mxu1 %v6459_v41  ;;  %v7669_v41 = vand.u32 4294901760, %v6656_v61 }
 0x249   :  { %2002 = vmatprep.mubr.f32.mxu1 %v7676_v19 }
 0x24a   :  { %v6671_v6 = vsub.f32 %v6656_v61, %v7669_v41  ;;  %v2037_v41 = vld [vmem:[%s7656_s5 + $0x20] sm:$0xff] }
 0x24c   :  { %2004 = vmatmul.mubr.f32.gmra.mrb[28].mxu1 %v6475_v24  ;;  %v7668_v24 = vand.u32 4294901760, %v6665_v30 }
 0x24d   :  { %2009 = vmatprep.mubr.f32.mxu1 %v7676_v19 }
 0x24e   :  { %v6687_v38 = vsub.f32 %v6665_v30, %v7668_v24 }
 0x250   :  { %2011 = vmatmul.mubr.f32.gmra.mrb[30].mxu1 %v6487_v20  ;;  %v985_v20 = vpop.permute.xlu0 %984 }
 0x251   :  { %3279 = vmatprep.mubr.f32.mxu1 %v7676_v19 }
 0x307   :  { %v1963_v0 = vpop.f32.mrb[16].mxu1 }
 0x308   :  { %v5294_v11 = vadd.f32 %v1963_v0, %v965_v32  ;;  %v1965_v23 = vpop.f32.mrb[17].mxu1 }
 0x309   :  { %v5295_v62 = vadd.f32 %v1965_v23, %v965_v32 }
 0x30a   :  { %5695 = vtanh.f32 %v5294_v11 }
 0x30b   :  { %5697 = vtanh.f32 %v5295_v62  ;;  %v1970_v14 = vpop.f32.mrb[18].mxu1 }
 0x30c   :  { %v5296_v40 = vadd.f32 %v1970_v14, %v970_v39  ;;  %v1972_v55 = vpop.f32.mrb[19].mxu1 }
 0x30d   :  { %v5297_v45 = vadd.f32 %v1972_v55, %v970_v39  ;;  %v995_v55 = vpop.permute.xlu0 %994 }
 0x30e   :  { %5699 = vtanh.f32 %v5296_v40 }
 0x30f   :  { %5701 = vtanh.f32 %v5297_v45  ;;  %v1977_v35 = vpop.f32.mrb[20].mxu1 }
 0x310   :  { %v5298_v44 = vadd.f32 %v1977_v35, %v975_v50  ;;  %v1979_v17 = vpop.f32.mrb[21].mxu1 }
 0x311   :  { %v5299_v56 = vadd.f32 %v1979_v17, %v975_v50 }
 0x312   :  { %5703 = vtanh.f32 %v5298_v44 }
 0x313   :  { %5705 = vtanh.f32 %v5299_v56  ;;  %v1984_v42 = vpop.f32.mrb[22].mxu1 }
 0x314   :  { %v5696_v46 = vpop.eup %5695  ;;  %v5300_v29 = vadd.f32 %v1984_v42, %v980_v12  ;;  %v1986_v59 = vpop.f32.mrb[23].mxu1 }
 0x315   :  { %v5698_v18 = vpop.eup %5697  ;;  %v5301_v34 = vadd.f32 %v1986_v59, %v980_v12  ;;  %v2115_v63 = vand.u32 4294901760, %v5696_v46 }
 0x316   :  { %5707 = vtanh.f32 %v5300_v29  ;;  %v2113_v47 = vand.u32 4294901760, %v5698_v18 }
 0x317   :  { %5709 = vtanh.f32 %v5301_v34  ;;  %v1991_v22 = vpop.f32.mrb[24].mxu1  ;;  %v6676_v13 = vsub.f32 %v5696_v46, %v2115_v63 }
 0x318   :  { %v5700_v4 = vpop.eup %5699  ;;  %v5302_v37 = vadd.f32 %v1991_v22, %v985_v20  ;;  %v1993_v25 = vpop.f32.mrb[25].mxu1  ;;  %v6681_v10 = vsub.f32 %v5698_v18, %v2113_v47 }
 0x319   :  { %v5702_v3 = vpop.eup %5701  ;;  %v5303_v53 = vadd.f32 %v1993_v25, %v985_v20  ;;  %v2119_v8 = vand.u32 4294901760, %v5700_v4  ;;  %v2290_v27 = vand.u32 4294901760, %v6676_v13  ;;  %v1000_v22 = vpop.permute.xlu1 %999 }
 0x31a   :  { %5711 = vtanh.f32 %v5302_v37  ;;  %v2117_v33 = vand.u32 4294901760, %v5702_v3  ;;  %v2284_v51 = vand.u32 4294901760, %v6681_v10 }
 0x31b   :  { %5713 = vtanh.f32 %v5303_v53  ;;  %v1998_v60 = vpop.f32.mrb[26].mxu1  ;;  %v6697_v21 = vpack.c.bf16 %v2119_v8, %v2115_v63  ;;  %v6699_v52 = vsub.f32 %v5700_v4, %v2119_v8  ;;  %v2291_v1 = vsub.f32 %v6676_v13, %v2290_v27 }
 0x31c   :  { %v5704_v26 = vpop.eup %5703  ;;  %v5304_v43 = vadd.f32 %v1998_v60, %v990_v49  ;;  %v2000_v5 = vpop.f32.mrb[27].mxu1  ;;  %v6704_v7 = vpack.c.bf16 %v2117_v33, %v2113_v47  ;;  %v6706_v28 = vsub.f32 %v5702_v3, %v2117_v33  ;;  %v2285_v32 = vsub.f32 %v6681_v10, %v2284_v51 }
 0x31d   :  { %v5706_v0 = vpop.eup %5705  ;;  %v5305_v11 = vadd.f32 %v2000_v5, %v990_v49  ;;  %v2123_v23 = vand.u32 4294901760, %v5704_v26  ;;  %v2292_v62 = vand.u32 4294901760, %v2291_v1  ;;  %v2302_v48 = vand.u32 4294901760, %v6699_v52 }
 0x31e   :  { %5715 = vtanh.f32 %v5304_v43  ;;  %4975 = vmatprep.subr.bf16.mxu0 %v6704_v7  ;;  %v2121_v39 = vand.u32 4294901760, %v5706_v0  ;;  %v2286_v14 = vand.u32 4294901760, %v2285_v32  ;;  %v2296_v40 = vand.u32 4294901760, %v6706_v28 }
 0x31f   :  { %5717 = vtanh.f32 %v5305_v11  ;;  %v2005_v45 = vpop.f32.mrb[28].mxu1  ;;  %4977 = vmatpush1.bf16.msra.mxu0 %v6697_v21  ;;  %v6715_v50 = vsub.f32 %v5704_v26, %v2123_v23  ;;  %v2303_v35 = vsub.f32 %v6699_v52, %v2302_v48 }
 0x320   :  { %v5708_v44 = vpop.eup %5707  ;;  %v5306_v17 = vadd.f32 %v2005_v45, %v995_v55  ;;  %v2007_v56 = vpop.f32.mrb[29].mxu1  ;;  %v6722_v36 = vsub.f32 %v5706_v0, %v2121_v39  ;;  %v2297_v12 = vsub.f32 %v6706_v28, %v2296_v40 }
 0x321   :  { %v5710_v46 = vpop.eup %5709  ;;  %v5307_v29 = vadd.f32 %v2007_v56, %v995_v55  ;;  %v2127_v59 = vand.u32 4294901760, %v5708_v44  ;;  %v2304_v18 = vand.u32 4294901760, %v2303_v35  ;;  %v2314_v34 = vand.u32 4294901760, %v6715_v50 }
 0x322   :  { %5719 = vtanh.f32 %v5306_v17  ;;  %v2125_v63 = vand.u32 4294901760, %v5710_v46  ;;  %v2298_v47 = vand.u32 4294901760, %v2297_v12  ;;  %v2308_v20 = vand.u32 4294901760, %v6722_v36 }
 0x323   :  { %5721 = vtanh.f32 %v5307_v29  ;;  %v2012_v57 = vpop.f32.mrb[30].mxu1  ;;  %v6729_v4 = vpack.c.bf16 %v2127_v59, %v2123_v23  ;;  %v6731_v37 = vsub.f32 %v5708_v44, %v2127_v59  ;;  %v6733_v25 = vpack.c.bf16 %v2304_v18, %v2292_v62 }
 0x324   :  { %v5712_v3 = vpop.eup %5711  ;;  %v5308_v53 = vadd.f32 %v2012_v57, %v1000_v22  ;;  %v2014_v8 = vpop.f32.mrb[31].mxu1  ;;  %v6735_v33 = vpack.c.bf16 %v2125_v63, %v2121_v39  ;;  %v6737_v49 = vsub.f32 %v5710_v46, %v2125_v63  ;;  %v6739_v60 = vpack.c.bf16 %v2298_v47, %v2286_v14 }
 0x325   :  { %v5714_v1 = vpop.eup %5713  ;;  %v5309_v26 = vadd.f32 %v2014_v8, %v1000_v22  ;;  %v2131_v43 = vand.u32 4294901760, %v5712_v3  ;;  %v2309_v5 = vsub.f32 %v6722_v36, %v2308_v20  ;;  %v2315_v32 = vsub.f32 %v6715_v50, %v2314_v34 }
 0x326   :  { %5723 = vtanh.f32 %v5308_v53  ;;  %4979 = vmatprep.subr.bf16.mxu0 %v6735_v33  ;;  %v2129_v0 = vand.u32 4294901760, %v5714_v1  ;;  %v2320_v11 = vand.u32 4294901760, %v6737_v49  ;;  %v2326_v23 = vand.u32 4294901760, %v6731_v37 }
 0x327   :  { %5725 = vtanh.f32 %v5309_v26  ;;  %4981 = vmatpush1.bf16.msra.mxu0 %v6729_v4  ;;  %v6751_v62 = vsub.f32 %v5712_v3, %v2131_v43  ;;  %v2310_v39 = vand.u32 4294901760, %v2309_v5  ;;  %v2316_v14 = vand.u32 4294901760, %v2315_v32 }
 0x328   :  { %v5716_v55 = vpop.eup %5715  ;;  %v6753_v45 = vsub.f32 %v5714_v1, %v2129_v0  ;;  %v2321_v35 = vsub.f32 %v6737_v49, %v2320_v11  ;;  %v2327_v44 = vsub.f32 %v6731_v37, %v2326_v23  ;;  %v6764_v59 = vpack.c.bf16 %v2296_v40, %v2284_v51 }
 0x329   :  { %v5718_v56 = vpop.eup %5717  ;;  %v2135_v12 = vand.u32 4294901760, %v5716_v55  ;;  %v2338_v46 = vand.u32 4294901760, %v6751_v62  ;;  %v6776_v8 = vpack.c.bf16 %v2302_v48, %v2290_v27 }
 0x32a   :  { %v2133_v18 = vand.u32 4294901760, %v5718_v56  ;;  %v2322_v63 = vand.u32 4294901760, %v2321_v35  ;;  %v2328_v47 = vand.u32 4294901760, %v2327_v44  ;;  %v2332_v22 = vand.u32 4294901760, %v6753_v45 }
 0x32b   :  { %v6767_v57 = vpack.c.bf16 %v2135_v12, %v2131_v43  ;;  %v6769_v3 = vsub.f32 %v5716_v55, %v2135_v12  ;;  %v2339_v53 = vsub.f32 %v6751_v62, %v2338_v46  ;;  %v6789_v44 = vand.u32 4294901760, %v6695_v16 }
 0x32c   :  { %v5720_v1 = vpop.eup %5719  ;;  %v6778_v51 = vpack.c.bf16 %v2133_v18, %v2129_v0  ;;  %v6780_v40 = vsub.f32 %v5718_v56, %v2133_v18  ;;  %v6782_v26 = vpack.c.bf16 %v2322_v63, %v2310_v39  ;;  %v6784_v5 = vpack.c.bf16 %v2328_v47, %v2316_v14 }
 0x32d   :  { %v5722_v43 = vpop.eup %5721  ;;  %v2139_v32 = vand.u32 4294901760, %v5720_v1  ;;  %v2333_v55 = vsub.f32 %v6753_v45, %v2332_v22  ;;  %v2350_v35 = vand.u32 4294901760, %v6769_v3  ;;  %v2340_v56 = vand.u32 4294901760, %v2339_v53 }
 0x32e   :  { %4983 = vmatprep.subr.bf16.mxu0 %v6778_v51  ;;  %v2137_v27 = vand.u32 4294901760, %v5722_v43  ;;  %v2344_v48 = vand.u32 4294901760, %v6780_v40  ;;  %v6803_v18 = vpack.c.bf16 %v2320_v11, %v2308_v20 }
 0x32f   :  { %4985 = vmatpush1.bf16.msra.mxu0 %v6767_v57  ;;  %v6798_v14 = vsub.f32 %v5720_v1, %v2139_v32  ;;  %v2351_v12 = vsub.f32 %v6769_v3, %v2350_v35  ;;  %v6813_v1 = vpack.c.bf16 %v2326_v23, %v2314_v34  ;;  %v6818_v11 = vpack.c.bf16 %v2350_v35, %v2338_v46 }
 0x330   :  { %7691 = vst [vmem:[#allocation5_spill] sm:$0xff] %v6803_v18  ;;  %v5724_v63 = vpop.eup %5723  ;;  %v6805_v47 = vsub.f32 %v5722_v43, %v2137_v27  ;;  %v2345_v24 = vsub.f32 %v6780_v40, %v2344_v48  ;;  %v6815_v53 = vpack.c.bf16 %v2344_v48, %v2332_v22  ;;  %v2334_v17 = vand.u32 4294901760, %v2333_v55 }
 0x331   :  { %v5726_v39 = vpop.eup %5725  ;;  %v2143_v0 = vand.u32 4294901760, %v5724_v63  ;;  %v2352_v29 = vand.u32 4294901760, %v2351_v12  ;;  %v2362_v20 = vand.u32 4294901760, %v6798_v14  ;;  %7693 = vst [vmem:[#allocation7_spill] sm:$0xff] %v6818_v11  ;;  %v2102_v23 = vsel %vm1002_vm1, %v2037_v41, 0 }
 0x332   :  { %7692 = vst [vmem:[#allocation6_spill] sm:$0xff] %v6815_v53  ;;  %v2141_v43 = vand.u32 4294901760, %v5726_v39  ;;  %v2346_v42 = vand.u32 4294901760, %v2345_v24  ;;  %v2356_v15 = vand.u32 4294901760, %v6805_v47  ;;  %v2218_v46 = vand.u32 4294901760, %v6691_v31  ;;  %v2038_v24 = vld [vmem:[%s7656_s5 + $0x28] sm:$0xff] }
 0x333   :  { %v6821_v54 = vpack.c.bf16 %v2143_v0, %v2139_v32  ;;  %v6823_v18 = vsub.f32 %v5724_v63, %v2143_v0  ;;  %v5000_v34 = vpack.c.bf16 %v2352_v29, %v2340_v56  ;;  %v6836_v32 = vsub.f32 %v6695_v16, %v6789_v44 }
 0x334   :  { %v6826_v22 = vpack.c.bf16 %v2141_v43, %v2137_v27  ;;  %v6828_v48 = vsub.f32 %v5726_v39, %v2141_v43  ;;  %v4998_v12 = vpack.c.bf16 %v2346_v42, %v2334_v17  ;;  %v2363_v55 = vsub.f32 %v6798_v14, %v2362_v20  ;;  %v2039_v43 = vld [vmem:[%s7656_s5 + $0x30] sm:$0xff] }
 0x335   :  { %v2374_v29 = vand.u32 4294901760, %v6823_v18  ;;  %v2357_v42 = vsub.f32 %v6805_v47, %v2356_v15  ;;  %v6845_v35 = vand.u32 4294901760, %v2102_v23  ;;  %v2105_v0 = vsel %vm1002_vm1, %v2038_v24, 0 }
 0x336   :  { %4987 = vmatprep.subr.bf16.mxu0 %v6826_v22  ;;  %v2368_v17 = vand.u32 4294901760, %v6828_v48  ;;  %v2209_v56 = vand.u32 4294901760, %v6687_v38  ;;  %v2219_v27 = vsub.f32 %v6691_v31, %v2218_v46  ;;  %v2229_v24 = vand.u32 4294901760, %v6836_v32 }
 0x337   :  { %4989 = vmatpush1.bf16.msra.mxu0 %v6821_v54  ;;  %v2375_v16 = vsub.f32 %v6823_v18, %v2374_v29  ;;  %v6852_v39 = vpack.c.bf16 %v2374_v29, %v2362_v20  ;;  %v2364_v20 = vand.u32 4294901760, %v2363_v55  ;;  %v2358_v38 = vand.u32 4294901760, %v2357_v42 }
 0x338   :  { %4991 = vmatprep.subr.bf16.mxu0 %v6739_v60  ;;  %v2369_v63 = vsub.f32 %v6828_v48, %v2368_v17  ;;  %v6860_v41 = vpack.c.bf16 %v2368_v17, %v2356_v15  ;;  %v7695_v60 = vand.u32 4294901760, %v6671_v6  ;;  %v6869_v11 = vsub.f32 %v2102_v23, %v6845_v35  ;;  %v2040_v6 = vld [vmem:[%s7656_s5 + $0x38] sm:$0xff] }
 0x339   :  { %7694 = vst [vmem:[#allocation8_spill] sm:$0xff] %v6852_v39  ;;  %v2376_v29 = vand.u32 4294901760, %v2375_v16  ;;  %v6871_v53 = vand.u32 4294901760, %v2105_v0  ;;  %v2108_v17 = vsel %vm1002_vm1, %v2039_v43, 0  ;;  %v2230_v23 = vsub.f32 %v6836_v32, %v2229_v24 }
 0x33a   :  { %2199 = vmatmul.mubr.f32.vlgmr.msra.gmra.mrb[16].mxu0 %v7695_v60  ;;  %v2370_v39 = vand.u32 4294901760, %v2369_v63  ;;  %v2220_v42 = vand.u32 4294901760, %v2219_v27  ;;  %v6887_v63 = vand.u32 4294901760, %v2108_v17 }
 0x33b   :  { %4993 = vmatpush1.bf16.msra.mxu0 %v6733_v25  ;;  %2204 = vmatprep.mubr.f32.mxu0 %v7676_v19  ;;  %v5004_v15 = vpack.c.bf16 %v2376_v29, %v2364_v20  ;;  %v2240_v25 = vand.u32 4294901760, %v6869_v11  ;;  %v6885_v16 = vsub.f32 %v2105_v0, %v6871_v53 }
 0x33c   :  { %4995 = vmatprep.subr.bf16.mxu0 %v6782_v26  ;;  %v5002_v55 = vpack.c.bf16 %v2370_v39, %v2358_v38  ;;  %v2111_v26 = vsel %vm1002_vm1, %v2040_v6, 0  ;;  %v2231_v39 = vand.u32 4294901760, %v2230_v23  ;;  %v6897_v0 = vsub.f32 %v2108_v17, %v6887_v63 }
 0x33d   :  { %v2241_v27 = vsub.f32 %v6869_v11, %v2240_v25  ;;  %v6899_v43 = vand.u32 4294901760, %v2111_v26  ;;  %v7698_v6 = vpack.c.bf16 %v6737_v49, %v6722_v36  ;;  %v7699_v23 = vpack.c.bf16 %v6731_v37, %v6715_v50  ;;  %v7705_v37 = vld [vmem:[#allocation5_spill] sm:$0xff] }
 0x33e   :  { %2210 = vmatmul.mubr.f32.gmra.mrb[18].mxu0 %v2209_v56  ;;  %v2251_v56 = vand.u32 4294901760, %v6885_v16  ;;  %v2262_v20 = vand.u32 4294901760, %v6897_v0  ;;  %v7703_v50 = vpack.c.bf16 %v6823_v18, %v6798_v14  ;;  %v7704_v36 = vand.u32 4294901760, %v6656_v61 }
 0x33f   :  { %4997 = vmatpush1.bf16.msra.mxu0 %v6784_v5  ;;  %2215 = vmatprep.mubr.f32.mxu0 %v7676_v19  ;;  %v2242_v5 = vand.u32 4294901760, %v2241_v27  ;;  %v6907_v29 = vsub.f32 %v2111_v26, %v6899_v43  ;;  %v7706_v49 = vand.u32 4294901760, %v6665_v30 }
 0x340   :  { %4999 = vmatprep.subr.bf16.mxu0 %v4998_v12  ;;  %v2252_v12 = vsub.f32 %v6885_v16, %v2251_v56  ;;  %v2263_v38 = vsub.f32 %v6897_v0, %v2262_v20 }
 0x341   :  { %v2273_v17 = vand.u32 4294901760, %v6907_v29 }
 0x342   :  { %2221 = vmatmul.mubr.f32.gmra.mrb[20].mxu0 %v2220_v42  ;;  %v2253_v60 = vand.u32 4294901760, %v2252_v12  ;;  %v7700_v42 = vpack.c.bf16 %v6780_v40, %v6753_v45 }
 0x343   :  { %5001 = vmatpush1.bf16.msra.mxu0 %v5000_v34  ;;  %2226 = vmatprep.mubr.f32.mxu0 %v7676_v19  ;;  %v7696_v34 = vpack.c.bf16 %v6706_v28, %v6681_v10  ;;  %v7697_v28 = vpack.c.bf16 %v6699_v52, %v6676_v13  ;;  %v7701_v13 = vpack.c.bf16 %v6769_v3, %v6751_v62  ;;  %v7707_v62 = vld [vmem:[#allocation6_spill] sm:$0xff] }
 0x344   :  { %5003 = vmatprep.subr.bf16.mxu0 %v5002_v55  ;;  %v2264_v55 = vand.u32 4294901760, %v2263_v38  ;;  %v7702_v52 = vpack.c.bf16 %v6828_v48, %v6805_v47  ;;  %v3121_v47 = vld [vmem:[%s7658_s7 + $0x10] sm:$0xff] }
 0x346   :  { %2232 = vmatmul.mubr.f32.gmra.mrb[22].mxu0 %v2231_v39 }
 0x347   :  { %5005 = vmatpush1.bf16.msra.mxu0 %v5004_v15  ;;  %2237 = vmatprep.mubr.f32.mxu0 %v7676_v19  ;;  %v2274_v15 = vsub.f32 %v6907_v29, %v2273_v17 }
 0x348   :  { %5007 = vmatprep.subr.bf16.mxu0 %v7696_v34 }
 0x349   :  { %v2275_v10 = vand.u32 4294901760, %v2274_v15 }
 0x34a   :  { %2243 = vmatmul.mubr.f32.gmra.mrb[24].mxu0 %v2242_v5 }
 0x34b   :  { %2248 = vmatprep.mubr.f32.mxu0 %v7676_v19 }
 0x34e   :  { %2254 = vmatmul.mubr.f32.gmra.mrb[26].mxu0 %v2253_v60 }
 0x34f   :  { %2259 = vmatprep.mubr.f32.mxu0 %v7676_v19 }
 0x352   :  { %2265 = vmatmul.mubr.f32.gmra.mrb[28].mxu0 %v2264_v55 }
 0x353   :  { %2270 = vmatprep.mubr.f32.mxu0 %v7676_v19 }
 0x356   :  { %2276 = vmatmul.mubr.f32.gmra.mrb[30].mxu0 %v2275_v10 }
 0x357   :  { %2426 = vmatprep.mubr.f32.mxu0 %v7676_v19 }
 0x35a   :  { %2428 = vmatmul.mubr.f32.vlgmr.msra.gmra.mrb[16].mxu0 %v6652_v58 }
 0x35b   :  { %5009 = vmatpush1.bf16.msra.mxu0 %v7697_v28  ;;  %2433 = vmatprep.mubr.f32.mxu0 %v7676_v19 }
 0x35c   :  { %5011 = vmatprep.subr.bf16.mxu0 %v7698_v6 }
 0x35e   :  { %2435 = vmatmul.mubr.f32.gmra.mrb[18].mxu0 %v6658_v2 }
 0x35f   :  { %5013 = vmatpush1.bf16.msra.mxu0 %v7699_v23  ;;  %2440 = vmatprep.mubr.f32.mxu0 %v7676_v19 }
 0x360   :  { %5015 = vmatprep.subr.bf16.mxu0 %v7700_v42 }
 0x362   :  { %2442 = vmatmul.mubr.f32.gmra.mrb[20].mxu0 %v6674_v9 }
 0x363   :  { %5017 = vmatpush1.bf16.msra.mxu0 %v7701_v13  ;;  %2447 = vmatprep.mubr.f32.mxu0 %v7676_v19 }
 0x364   :  { %5019 = vmatprep.subr.bf16.mxu0 %v7702_v52 }
 0x366   :  { %2449 = vmatmul.mubr.f32.gmra.mrb[22].mxu0 %v6789_v44 }
 0x367   :  { %5021 = vmatpush1.bf16.msra.mxu0 %v7703_v50  ;;  %2454 = vmatprep.mubr.f32.mxu0 %v7676_v19 }
 0x368   :  { %5023 = vmatprep.subr.bf16.mxu0 %v6704_v7 }
 0x36a   :  { %2456 = vmatmul.mubr.f32.gmra.mrb[24].mxu0 %v6845_v35 }
 0x36b   :  { %2461 = vmatprep.mubr.f32.mxu0 %v7676_v19 }
 0x36e   :  { %2463 = vmatmul.mubr.f32.gmra.mrb[26].mxu0 %v6871_v53 }
 0x36f   :  { %2468 = vmatprep.mubr.f32.mxu0 %v7676_v19 }
 0x372   :  { %2470 = vmatmul.mubr.f32.gmra.mrb[28].mxu0 %v6887_v63 }
 0x373   :  { %2475 = vmatprep.mubr.f32.mxu0 %v7676_v19 }
 0x376   :  { %2477 = vmatmul.mubr.f32.gmra.mrb[30].mxu0 %v6899_v43 }
 0x377   :  { %2579 = vmatprep.mubr.f32.mxu0 %v7676_v19 }
 0x37a   :  { %2582 = vmatmul.mubr.f32.vlgmr.msra.gmra.mrb[16].mxu0 %v6656_v61  ;;  %v7708_v61 = vld [vmem:[#allocation7_spill] sm:$0xff] }
 0x37b   :  { %5025 = vmatpush1.bf16.msra.mxu0 %v6697_v21  ;;  %2587 = vmatprep.mubr.f32.mxu0 %v7676_v19 }
 0x37c   :  { %5027 = vmatprep.subr.bf16.mxu0 %v6735_v33 }
 0x37e   :  { %2590 = vmatmul.mubr.f32.gmra.mrb[18].mxu0 %v6665_v30  ;;  %v7709_v30 = vld [vmem:[#allocation8_spill] sm:$0xff] }
 0x37f   :  { %5029 = vmatpush1.bf16.msra.mxu0 %v6729_v4  ;;  %2595 = vmatprep.mubr.f32.mxu0 %v7676_v19 }
 0x380   :  { %5031 = vmatprep.subr.bf16.mxu0 %v6778_v51 }
 0x382   :  { %2598 = vmatmul.mubr.f32.gmra.mrb[20].mxu0 %v6691_v31 }
 0x383   :  { %5033 = vmatpush1.bf16.msra.mxu0 %v6767_v57  ;;  %2603 = vmatprep.mubr.f32.mxu0 %v7676_v19 }
 0x384   :  { %5035 = vmatprep.subr.bf16.mxu0 %v6826_v22 }
 0x386   :  { %2606 = vmatmul.mubr.f32.gmra.mrb[22].mxu0 %v6836_v32 }
 0x387   :  { %5037 = vmatpush1.bf16.msra.mxu0 %v6821_v54  ;;  %2611 = vmatprep.mubr.f32.mxu0 %v7676_v19 }
 0x388   :  { %5039 = vmatprep.subr.bf16.mxu0 %v6764_v59  ;;  %v2057_v59 = vpop.permute.xlu1 %2056 }
 0x38a   :  { %2614 = vmatmul.mubr.f32.gmra.mrb[24].mxu0 %v6869_v11 }
 0x38b   :  { %2619 = vmatprep.mubr.f32.mxu0 %v7676_v19 }
 0x38c   :  { %v2067_v32 = vpop.permute.xlu1 %2066 }
 0x38e   :  { %2622 = vmatmul.mubr.f32.gmra.mrb[26].mxu0 %v6885_v16 }
 0x38f   :  { %2627 = vmatprep.mubr.f32.mxu0 %v7676_v19 }
 0x390   :  { %v2077_v50 = vpop.permute.xlu1 %2076 }
 0x392   :  { %2630 = vmatmul.mubr.f32.gmra.mrb[28].mxu0 %v6897_v0 }
 0x393   :  { %2635 = vmatprep.mubr.f32.mxu0 %v7676_v19 }
 0x396   :  { %2638 = vmatmul.mubr.f32.gmra.mrb[30].mxu0 %v6907_v29 }
 0x397   :  { %2724 = vmatprep.mubr.f32.mxu0 %v7676_v19 }
 0x39a   :  { %2728 = vmatmul.mubr.f32.vlgmr.msra.gmra.mrb[16].mxu0 %v7704_v36 }
 0x39b   :  { %5041 = vmatpush1.bf16.msra.mxu0 %v6776_v8  ;;  %2733 = vmatprep.mubr.f32.mxu0 %v7676_v19 }
 0x39c   :  { %5043 = vmatprep.subr.bf16.mxu0 %v7705_v37 }
 0x39e   :  { %2737 = vmatmul.mubr.f32.gmra.mrb[18].mxu0 %v7706_v49 }
 0x39f   :  { %5045 = vmatpush1.bf16.msra.mxu0 %v6813_v1  ;;  %2742 = vmatprep.mubr.f32.mxu0 %v7676_v19 }
 0x3a0   :  { %5047 = vmatprep.subr.bf16.mxu0 %v7707_v62 }
 0x3a2   :  { %2746 = vmatmul.mubr.f32.gmra.mrb[20].mxu0 %v2218_v46  ;;  %v3182_v46 = vsel %vm1002_vm1, %v3121_v47, 0 }
 0x3a3   :  { %5049 = vmatpush1.bf16.msra.mxu0 %v7708_v61  ;;  %2751 = vmatprep.mubr.f32.mxu0 %v7676_v19 }
 0x3a4   :  { %5051 = vmatprep.subr.bf16.mxu0 %v6860_v41 }
 0x3a6   :  { %2755 = vmatmul.mubr.f32.gmra.mrb[22].mxu0 %v2229_v24 }
 0x3a7   :  { %5053 = vmatpush1.bf16.msra.mxu0 %v7709_v30  ;;  %2760 = vmatprep.mubr.f32.mxu0 %v7676_v19 }
 0x3a8   :  { %5055 = vmatprep.subr.bf16.mxu0 %v6704_v7 }
 0x3aa   :  { %2764 = vmatmul.mubr.f32.gmra.mrb[24].mxu0 %v2240_v25 }
 0x3ab   :  { %2769 = vmatprep.mubr.f32.mxu0 %v7676_v19 }
 0x3ae   :  { %2773 = vmatmul.mubr.f32.gmra.mrb[26].mxu0 %v2251_v56  ;;  %v7086_v56 = vand.u32 4294901760, %v3182_v46 }
 0x3af   :  { %2778 = vmatprep.mubr.f32.mxu0 %v7676_v19 }
 0x3b0   :  { %v7103_v23 = vsub.f32 %v3182_v46, %v7086_v56 }
 0x3b2   :  { %2782 = vmatmul.mubr.f32.gmra.mrb[28].mxu0 %v2262_v20  ;;  %v3122_v20 = vld [vmem:[%s7658_s7 + $0x18] sm:$0xff] }
 0x3b3   :  { %2787 = vmatprep.mubr.f32.mxu0 %v7676_v19  ;;  %v7107_v52 = vsel %vm1002_vm1, %v3122_v20, 0 }
 0x3b6   :  { %2791 = vmatmul.mubr.f32.gmra.mrb[30].mxu0 %v2273_v17 }
 0x3b7   :  { %2909 = vmatprep.mubr.f32.mxu0 %v7676_v19 }
 0x3ba   :  { %2911 = vmatmul.mubr.f32.vlgmr.msra.gmra.mrb[16].mxu0 %v6652_v58 }
 0x3bb   :  { %5057 = vmatpush1.bf16.msra.mxu0 %v6697_v21  ;;  %2916 = vmatprep.mubr.f32.mxu0 %v7676_v19 }
 0x3bc   :  { %5059 = vmatprep.subr.bf16.mxu0 %v6735_v33 }
 0x3be   :  { %2918 = vmatmul.mubr.f32.gmra.mrb[18].mxu0 %v6658_v2 }
 0x3bf   :  { %5061 = vmatpush1.bf16.msra.mxu0 %v6729_v4  ;;  %2923 = vmatprep.mubr.f32.mxu0 %v7676_v19 }
 0x3c0   :  { %5063 = vmatprep.subr.bf16.mxu0 %v6778_v51 }
 0x3c2   :  { %2925 = vmatmul.mubr.f32.gmra.mrb[20].mxu0 %v6674_v9 }
 0x3c3   :  { %5065 = vmatpush1.bf16.msra.mxu0 %v6767_v57  ;;  %2930 = vmatprep.mubr.f32.mxu0 %v7676_v19 }
 0x3c4   :  { %5067 = vmatprep.subr.bf16.mxu0 %v6826_v22 }
 0x3c6   :  { %2932 = vmatmul.mubr.f32.gmra.mrb[22].mxu0 %v6789_v44 }
 0x3c7   :  { %5069 = vmatpush1.bf16.msra.mxu0 %v6821_v54  ;;  %2937 = vmatprep.mubr.f32.mxu0 %v7676_v19  ;;  %v2052_v54 = vpop.permute.xlu0 %2051 }
 0x3ca   :  { %2939 = vmatmul.mubr.f32.gmra.mrb[24].mxu0 %v6845_v35 }
 0x3cb   :  { %2944 = vmatprep.mubr.f32.mxu0 %v7676_v19  ;;  %v2062_v14 = vpop.permute.xlu0 %2061 }
 0x3ce   :  { %2946 = vmatmul.mubr.f32.gmra.mrb[26].mxu0 %v6871_v53 }
 0x3cf   :  { %2951 = vmatprep.mubr.f32.mxu0 %v7676_v19 }
 0x3d2   :  { %2953 = vmatmul.mubr.f32.gmra.mrb[28].mxu0 %v6887_v63 }
 0x3d3   :  { %2958 = vmatprep.mubr.f32.mxu0 %v7676_v19 }
 0x3d6   :  { %2960 = vmatmul.mubr.f32.gmra.mrb[30].mxu0 %v6899_v43 }
 0x3d7   :  { %3046 = vmatprep.mubr.f32.mxu0 %v7676_v19 }
 0x3da   :  { %3048 = vmatmul.mubr.f32.vlgmr.msra.gmra.mrb[16].mxu0 %v6652_v58  ;;  %v3119_v58 = vld [vmem:[%s7658_s7] sm:$0xff] }
 0x3db   :  { %3053 = vmatprep.mubr.f32.mxu0 %v7676_v19 }
 0x3de   :  { %3055 = vmatmul.mubr.f32.gmra.mrb[18].mxu0 %v6658_v2  ;;  %v3176_v2 = vsel %vm1002_vm1, %v3119_v58, 0 }
 0x3df   :  { %3060 = vmatprep.mubr.f32.mxu0 %v7676_v19  ;;  %v7064_v4 = vand.u32 4294901760, %v3176_v2 }
 0x3e1   :  { %v7068_v51 = vsub.f32 %v3176_v2, %v7064_v4 }
 0x3e2   :  { %3062 = vmatmul.mubr.f32.gmra.mrb[20].mxu0 %v6674_v9  ;;  %v3120_v9 = vld [vmem:[%s7658_s7 + $0x8] sm:$0xff] }
 0x3e3   :  { %3067 = vmatprep.mubr.f32.mxu0 %v7676_v19  ;;  %v3179_v45 = vsel %vm1002_vm1, %v3120_v9, 0  ;;  %v7671_v11 = vand.u32 4294901760, %v7068_v51 }
 0x3e4   :  { %v7070_v40 = vand.u32 4294901760, %v3179_v45 }
 0x3e5   :  { %v7083_v16 = vsub.f32 %v7068_v51, %v7671_v11  ;;  %v3123_v11 = vld [vmem:[%s7658_s7 + $0x20] sm:$0xff] }
 0x3e6   :  { %3069 = vmatmul.mubr.f32.gmra.mrb[22].mxu0 %v6789_v44  ;;  %v7077_v22 = vsub.f32 %v3179_v45, %v7070_v40 }
 0x3e7   :  { %3074 = vmatprep.mubr.f32.mxu0 %v7676_v19 }
 0x3ea   :  { %3076 = vmatmul.mubr.f32.gmra.mrb[24].mxu0 %v6845_v35 }
 0x3eb   :  { %3081 = vmatprep.mubr.f32.mxu0 %v7676_v19 }
 0x3ee   :  { %3083 = vmatmul.mubr.f32.gmra.mrb[26].mxu0 %v6871_v53 }
 0x3ef   :  { %3088 = vmatprep.mubr.f32.mxu0 %v7676_v19 }
 0x3f2   :  { %3090 = vmatmul.mubr.f32.gmra.mrb[28].mxu0 %v6887_v63  ;;  %v7670_v63 = vand.u32 4294901760, %v7077_v22 }
 0x3f3   :  { %3095 = vmatprep.mubr.f32.mxu0 %v7676_v19 }
 0x3f4   :  { %v7099_v55 = vsub.f32 %v7077_v22, %v7670_v63 }
 0x3f6   :  { %3097 = vmatmul.mubr.f32.gmra.mrb[30].mxu0 %v6899_v43  ;;  %v2072_v43 = vpop.permute.xlu0 %2071 }
 0x3f7   :  { %4451 = vmatprep.mubr.f32.mxu0 %v7676_v19 }
 0x4ad   :  { %v3049_v31 = vpop.f32.mrb[16].mxu0 }
 0x4ae   :  { %v5310_v21 = vadd.f32 %v3049_v31, %v2052_v54  ;;  %v3051_v7 = vpop.f32.mrb[17].mxu0 }
 0x4af   :  { %v5311_v33 = vadd.f32 %v3051_v7, %v2052_v54 }
 0x4b0   :  { %5727 = vtanh.f32 %v5310_v21 }
 0x4b1   :  { %5729 = vtanh.f32 %v5311_v33  ;;  %v3056_v57 = vpop.f32.mrb[18].mxu0 }
 0x4b2   :  { %v5312_v3 = vadd.f32 %v3056_v57, %v2057_v59  ;;  %v3058_v8 = vpop.f32.mrb[19].mxu0 }
 0x4b3   :  { %v5313_v44 = vadd.f32 %v3058_v8, %v2057_v59  ;;  %v2082_v8 = vpop.permute.xlu0 %2081 }
 0x4b4   :  { %5731 = vtanh.f32 %v5312_v3 }
 0x4b5   :  { %5733 = vtanh.f32 %v5313_v44  ;;  %v3063_v18 = vpop.f32.mrb[20].mxu0 }
 0x4b6   :  { %v5314_v1 = vadd.f32 %v3063_v18, %v2062_v14  ;;  %v3065_v53 = vpop.f32.mrb[21].mxu0 }
 0x4b7   :  { %v5315_v48 = vadd.f32 %v3065_v53, %v2062_v14 }
 0x4b8   :  { %5735 = vtanh.f32 %v5314_v1 }
 0x4b9   :  { %5737 = vtanh.f32 %v5315_v48  ;;  %v3070_v41 = vpop.f32.mrb[22].mxu0 }
 0x4ba   :  { %v5728_v35 = vpop.eup %5727  ;;  %v5316_v24 = vadd.f32 %v3070_v41, %v2067_v32  ;;  %v3072_v25 = vpop.f32.mrb[23].mxu0 }
 0x4bb   :  { %v5730_v26 = vpop.eup %5729  ;;  %v5317_v39 = vadd.f32 %v3072_v25, %v2067_v32  ;;  %v3201_v27 = vand.u32 4294901760, %v5728_v35 }
 0x4bc   :  { %5739 = vtanh.f32 %v5316_v24  ;;  %v3199_v0 = vand.u32 4294901760, %v5730_v26 }
 0x4bd   :  { %5741 = vtanh.f32 %v5317_v39  ;;  %v3077_v5 = vpop.f32.mrb[24].mxu0  ;;  %v7088_v12 = vsub.f32 %v5728_v35, %v3201_v27 }
 0x4be   :  { %v5732_v29 = vpop.eup %5731  ;;  %v5318_v34 = vadd.f32 %v3077_v5, %v2072_v43  ;;  %v3079_v60 = vpop.f32.mrb[25].mxu0  ;;  %v7093_v38 = vsub.f32 %v5730_v26, %v3199_v0 }
 0x4bf   :  { %v5734_v15 = vpop.eup %5733  ;;  %v5319_v10 = vadd.f32 %v3079_v60, %v2072_v43  ;;  %v3205_v28 = vand.u32 4294901760, %v5732_v29  ;;  %v3376_v6 = vand.u32 4294901760, %v7088_v12  ;;  %v2087_v5 = vpop.permute.xlu1 %2086 }
 0x4c0   :  { %5743 = vtanh.f32 %v5318_v34  ;;  %v3203_v42 = vand.u32 4294901760, %v5734_v15  ;;  %v3370_v13 = vand.u32 4294901760, %v7093_v38 }
 0x4c1   :  { %5745 = vtanh.f32 %v5319_v10  ;;  %v3084_v36 = vpop.f32.mrb[26].mxu0  ;;  %v7109_v37 = vpack.c.bf16 %v3205_v28, %v3201_v27  ;;  %v7111_v49 = vsub.f32 %v5732_v29, %v3205_v28  ;;  %v3377_v62 = vsub.f32 %v7088_v12, %v3376_v6 }
 0x4c2   :  { %v5736_v61 = vpop.eup %5735  ;;  %v5320_v30 = vadd.f32 %v3084_v36, %v2077_v50  ;;  %v3086_v58 = vpop.f32.mrb[27].mxu0  ;;  %v7116_v2 = vpack.c.bf16 %v3203_v42, %v3199_v0  ;;  %v7118_v9 = vsub.f32 %v5734_v15, %v3203_v42  ;;  %v3371_v54 = vsub.f32 %v7093_v38, %v3370_v13 }
 0x4c3   :  { %v5738_v31 = vpop.eup %5737  ;;  %v5321_v21 = vadd.f32 %v3086_v58, %v2077_v50  ;;  %v3209_v7 = vand.u32 4294901760, %v5736_v61  ;;  %v3378_v33 = vand.u32 4294901760, %v3377_v62  ;;  %v3388_v45 = vand.u32 4294901760, %v7111_v49 }
 0x4c4   :  { %5747 = vtanh.f32 %v5320_v30  ;;  %5071 = vmatprep.subr.bf16.mxu1 %v7116_v2  ;;  %v3207_v59 = vand.u32 4294901760, %v5738_v31  ;;  %v3372_v57 = vand.u32 4294901760, %v3371_v54  ;;  %v3382_v3 = vand.u32 4294901760, %v7118_v9 }
 0x4c5   :  { %5749 = vtanh.f32 %v5321_v21  ;;  %v3091_v44 = vpop.f32.mrb[28].mxu0  ;;  %5073 = vmatpush1.bf16.msra.mxu1 %v7109_v37  ;;  %v7127_v14 = vsub.f32 %v5736_v61, %v3209_v7  ;;  %v3389_v18 = vsub.f32 %v7111_v49, %v3388_v45 }
 0x4c6   :  { %v5740_v1 = vpop.eup %5739  ;;  %v5322_v53 = vadd.f32 %v3091_v44, %v2082_v8  ;;  %v3093_v48 = vpop.f32.mrb[29].mxu0  ;;  %v7134_v46 = vsub.f32 %v5738_v31, %v3207_v59  ;;  %v3383_v32 = vsub.f32 %v7118_v9, %v3382_v3 }
 0x4c7   :  { %v5742_v35 = vpop.eup %5741  ;;  %v5323_v24 = vadd.f32 %v3093_v48, %v2082_v8  ;;  %v3213_v25 = vand.u32 4294901760, %v5740_v1  ;;  %v3390_v26 = vand.u32 4294901760, %v3389_v18  ;;  %v3400_v39 = vand.u32 4294901760, %v7127_v14 }
 0x4c8   :  { %5751 = vtanh.f32 %v5322_v53  ;;  %v3211_v27 = vand.u32 4294901760, %v5742_v35  ;;  %v3384_v0 = vand.u32 4294901760, %v3383_v32  ;;  %v3394_v43 = vand.u32 4294901760, %v7134_v46 }
 0x4c9   :  { %5753 = vtanh.f32 %v5323_v24  ;;  %v3098_v20 = vpop.f32.mrb[30].mxu0  ;;  %v7141_v29 = vpack.c.bf16 %v3213_v25, %v3209_v7  ;;  %v7143_v34 = vsub.f32 %v5740_v1, %v3213_v25  ;;  %v7145_v60 = vpack.c.bf16 %v3390_v26, %v3378_v33 }
 0x4ca   :  { %v5744_v15 = vpop.eup %5743  ;;  %v5324_v10 = vadd.f32 %v3098_v20, %v2087_v5  ;;  %v3100_v28 = vpop.f32.mrb[31].mxu0  ;;  %v7147_v42 = vpack.c.bf16 %v3211_v27, %v3207_v59  ;;  %v7149_v50 = vsub.f32 %v5742_v35, %v3211_v27  ;;  %v7151_v36 = vpack.c.bf16 %v3384_v0, %v3372_v57 }
 0x4cb   :  { %v5746_v62 = vpop.eup %5745  ;;  %v5325_v61 = vadd.f32 %v3100_v28, %v2087_v5  ;;  %v3217_v30 = vand.u32 4294901760, %v5744_v15  ;;  %v3395_v58 = vsub.f32 %v7134_v46, %v3394_v43  ;;  %v3401_v54 = vsub.f32 %v7127_v14, %v3400_v39 }
 0x4cc   :  { %5755 = vtanh.f32 %v5324_v10  ;;  %5075 = vmatprep.subr.bf16.mxu1 %v7147_v42  ;;  %v3215_v31 = vand.u32 4294901760, %v5746_v62  ;;  %v3406_v21 = vand.u32 4294901760, %v7149_v50  ;;  %v3412_v7 = vand.u32 4294901760, %v7143_v34 }
 0x4cd   :  { %5757 = vtanh.f32 %v5325_v61  ;;  %5077 = vmatpush1.bf16.msra.mxu1 %v7141_v29  ;;  %v7163_v33 = vsub.f32 %v5744_v15, %v3217_v30  ;;  %v3396_v59 = vand.u32 4294901760, %v3395_v58  ;;  %v3402_v57 = vand.u32 4294901760, %v3401_v54 }
 0x4ce   :  { %v5748_v8 = vpop.eup %5747  ;;  %v7165_v44 = vsub.f32 %v5746_v62, %v3215_v31  ;;  %v3407_v18 = vsub.f32 %v7149_v50, %v3406_v21  ;;  %v3413_v1 = vsub.f32 %v7143_v34, %v3412_v7  ;;  %v7176_v25 = vpack.c.bf16 %v3382_v3, %v3370_v13 }
 0x4cf   :  { %v5750_v48 = vpop.eup %5749  ;;  %v3221_v32 = vand.u32 4294901760, %v5748_v8  ;;  %v3424_v35 = vand.u32 4294901760, %v7163_v33  ;;  %v7188_v28 = vpack.c.bf16 %v3388_v45, %v3376_v6 }
 0x4d0   :  { %v3219_v26 = vand.u32 4294901760, %v5750_v48  ;;  %v3408_v27 = vand.u32 4294901760, %v3407_v18  ;;  %v3414_v0 = vand.u32 4294901760, %v3413_v1  ;;  %v3418_v5 = vand.u32 4294901760, %v7165_v44 }
 0x4d1   :  { %v7179_v20 = vpack.c.bf16 %v3221_v32, %v3217_v30  ;;  %v7181_v15 = vsub.f32 %v5748_v8, %v3221_v32  ;;  %v3425_v10 = vsub.f32 %v7163_v33, %v3424_v35  ;;  %v7201_v1 = vand.u32 4294901760, %v7107_v52 }
 0x4d2   :  { %v5752_v62 = vpop.eup %5751  ;;  %v7190_v13 = vpack.c.bf16 %v3219_v26, %v3215_v31  ;;  %v7192_v3 = vsub.f32 %v5750_v48, %v3219_v26  ;;  %v7194_v61 = vpack.c.bf16 %v3408_v27, %v3396_v59  ;;  %v7196_v58 = vpack.c.bf16 %v3414_v0, %v3402_v57 }
 0x4d3   :  { %v5754_v30 = vpop.eup %5753  ;;  %v3225_v54 = vand.u32 4294901760, %v5752_v62  ;;  %v3419_v8 = vsub.f32 %v7165_v44, %v3418_v5  ;;  %v3436_v18 = vand.u32 4294901760, %v7181_v15  ;;  %v3426_v48 = vand.u32 4294901760, %v3425_v10 }
 0x4d4   :  { %5079 = vmatprep.subr.bf16.mxu1 %v7190_v13  ;;  %v3223_v6 = vand.u32 4294901760, %v5754_v30  ;;  %v3430_v45 = vand.u32 4294901760, %v7192_v3  ;;  %v7215_v26 = vpack.c.bf16 %v3406_v21, %v3394_v43 }
 0x4d5   :  { %5081 = vmatpush1.bf16.msra.mxu1 %v7179_v20  ;;  %v7210_v57 = vsub.f32 %v5752_v62, %v3225_v54  ;;  %v3437_v32 = vsub.f32 %v7181_v15, %v3436_v18  ;;  %v7225_v62 = vpack.c.bf16 %v3412_v7, %v3400_v39  ;;  %v7230_v21 = vpack.c.bf16 %v3436_v18, %v3424_v35 }
 0x4d6   :  { %7710 = vst [vmem:[#allocation5_spill] sm:$0xff] %v7215_v26  ;;  %v5756_v27 = vpop.eup %5755  ;;  %v7217_v0 = vsub.f32 %v5754_v30, %v3223_v6  ;;  %v3431_v63 = vsub.f32 %v7192_v3, %v3430_v45  ;;  %v7227_v10 = vpack.c.bf16 %v3430_v45, %v3418_v5  ;;  %v3420_v53 = vand.u32 4294901760, %v3419_v8 }
 0x4d7   :  { %v5758_v59 = vpop.eup %5757  ;;  %v3229_v31 = vand.u32 4294901760, %v5756_v27  ;;  %v3438_v24 = vand.u32 4294901760, %v3437_v32  ;;  %v3448_v43 = vand.u32 4294901760, %v7210_v57  ;;  %7712 = vst [vmem:[#allocation7_spill] sm:$0xff] %v7230_v21  ;;  %v3188_v7 = vsel %vm1002_vm1, %v3123_v11, 0 }
 0x4d8   :  { %7711 = vst [vmem:[#allocation6_spill] sm:$0xff] %v7227_v10  ;;  %v3227_v30 = vand.u32 4294901760, %v5758_v59  ;;  %v3432_v41 = vand.u32 4294901760, %v3431_v63  ;;  %v3442_v47 = vand.u32 4294901760, %v7217_v0  ;;  %v3304_v35 = vand.u32 4294901760, %v7103_v23  ;;  %v3124_v63 = vld [vmem:[%s7658_s7 + $0x28] sm:$0xff] }
 0x4d9   :  { %v7233_v17 = vpack.c.bf16 %v3229_v31, %v3225_v54  ;;  %v7235_v26 = vsub.f32 %v5756_v27, %v3229_v31  ;;  %v5096_v39 = vpack.c.bf16 %v3438_v24, %v3426_v48  ;;  %v7248_v54 = vsub.f32 %v7107_v52, %v7201_v1 }
 0x4da   :  { %v7238_v5 = vpack.c.bf16 %v3227_v30, %v3223_v6  ;;  %v7240_v45 = vsub.f32 %v5758_v59, %v3227_v30  ;;  %v5094_v32 = vpack.c.bf16 %v3432_v41, %v3420_v53  ;;  %v3449_v8 = vsub.f32 %v7210_v57, %v3448_v43  ;;  %v3125_v30 = vld [vmem:[%s7658_s7 + $0x30] sm:$0xff] }
 0x4db   :  { %v3460_v24 = vand.u32 4294901760, %v7235_v26  ;;  %v3443_v41 = vsub.f32 %v7217_v0, %v3442_v47  ;;  %v7257_v18 = vand.u32 4294901760, %v3188_v7  ;;  %v3191_v31 = vsel %vm1002_vm1, %v3124_v63, 0 }
 0x4dc   :  { %5083 = vmatprep.subr.bf16.mxu1 %v7238_v5  ;;  %v3454_v53 = vand.u32 4294901760, %v7240_v45  ;;  %v3295_v48 = vand.u32 4294901760, %v7099_v55  ;;  %v3305_v6 = vsub.f32 %v7103_v23, %v3304_v35  ;;  %v3315_v63 = vand.u32 4294901760, %v7248_v54 }
 0x4dd   :  { %5085 = vmatpush1.bf16.msra.mxu1 %v7233_v17  ;;  %v3461_v52 = vsub.f32 %v7235_v26, %v3460_v24  ;;  %v7264_v59 = vpack.c.bf16 %v3460_v24, %v3448_v43  ;;  %v3450_v43 = vand.u32 4294901760, %v3449_v8  ;;  %v3444_v55 = vand.u32 4294901760, %v3443_v41 }
 0x4de   :  { %5087 = vmatprep.subr.bf16.mxu1 %v7151_v36  ;;  %v3455_v27 = vsub.f32 %v7240_v45, %v3454_v53  ;;  %v7272_v11 = vpack.c.bf16 %v3454_v53, %v3442_v47  ;;  %v7714_v36 = vand.u32 4294901760, %v7083_v16  ;;  %v7281_v21 = vsub.f32 %v3188_v7, %v7257_v18  ;;  %v3126_v16 = vld [vmem:[%s7658_s7 + $0x38] sm:$0xff] }
 0x4df   :  { %7713 = vst [vmem:[#allocation8_spill] sm:$0xff] %v7264_v59  ;;  %v3462_v24 = vand.u32 4294901760, %v3461_v52  ;;  %v7283_v10 = vand.u32 4294901760, %v3191_v31  ;;  %v3194_v53 = vsel %vm1002_vm1, %v3125_v30, 0  ;;  %v3316_v7 = vsub.f32 %v7248_v54, %v3315_v63 }
 0x4e0   :  { %3285 = vmatmul.mubr.f32.vlgmr.msra.gmra.mrb[32].mxu1 %v7714_v36  ;;  %v3456_v59 = vand.u32 4294901760, %v3455_v27  ;;  %v3306_v41 = vand.u32 4294901760, %v3305_v6  ;;  %v7299_v27 = vand.u32 4294901760, %v3194_v53 }
 0x4e1   :  { %5089 = vmatpush1.bf16.msra.mxu1 %v7145_v60  ;;  %3290 = vmatprep.mubr.f32.mxu1 %v7676_v19  ;;  %v5100_v47 = vpack.c.bf16 %v3462_v24, %v3450_v43  ;;  %v3326_v60 = vand.u32 4294901760, %v7281_v21  ;;  %v7297_v52 = vsub.f32 %v3191_v31, %v7283_v10 }
 0x4e2   :  { %5091 = vmatprep.subr.bf16.mxu1 %v7194_v61  ;;  %v5098_v8 = vpack.c.bf16 %v3456_v59, %v3444_v55  ;;  %v3197_v61 = vsel %vm1002_vm1, %v3126_v16, 0  ;;  %v3317_v59 = vand.u32 4294901760, %v3316_v7  ;;  %v7309_v31 = vsub.f32 %v3194_v53, %v7299_v27 }
 0x4e3   :  { %v3327_v6 = vsub.f32 %v7281_v21, %v3326_v60  ;;  %v7311_v30 = vand.u32 4294901760, %v3197_v61  ;;  %v7717_v16 = vpack.c.bf16 %v7149_v50, %v7134_v46  ;;  %v7718_v7 = vpack.c.bf16 %v7143_v34, %v7127_v14  ;;  %v7724_v34 = vld [vmem:[#allocation5_spill] sm:$0xff] }
 0x4e4   :  { %3296 = vmatmul.mubr.f32.gmra.mrb[34].mxu1 %v3295_v48  ;;  %v3337_v48 = vand.u32 4294901760, %v7297_v52  ;;  %v3348_v43 = vand.u32 4294901760, %v7309_v31  ;;  %v7722_v14 = vpack.c.bf16 %v7235_v26, %v7210_v57  ;;  %v7723_v46 = vand.u32 4294901760, %v7068_v51 }
 0x4e5   :  { %5093 = vmatpush1.bf16.msra.mxu1 %v7196_v58  ;;  %3301 = vmatprep.mubr.f32.mxu1 %v7676_v19  ;;  %v3328_v58 = vand.u32 4294901760, %v3327_v6  ;;  %v7319_v24 = vsub.f32 %v3197_v61, %v7311_v30  ;;  %v7725_v50 = vand.u32 4294901760, %v7077_v22 }
 0x4e6   :  { %5095 = vmatprep.subr.bf16.mxu1 %v5094_v32  ;;  %v3338_v32 = vsub.f32 %v7297_v52, %v3337_v48  ;;  %v3349_v55 = vsub.f32 %v7309_v31, %v3348_v43 }
 0x4e7   :  { %v3359_v53 = vand.u32 4294901760, %v7319_v24 }
 0x4e8   :  { %3307 = vmatmul.mubr.f32.gmra.mrb[36].mxu1 %v3306_v41  ;;  %v3339_v36 = vand.u32 4294901760, %v3338_v32  ;;  %v7719_v41 = vpack.c.bf16 %v7192_v3, %v7165_v44  ;;  %v4205_v44 = vld [vmem:[%s7660_s9] sm:$0xff]  ;;  %s5817_s9 = smov [#allocation2]  }
 0x4e9   :  { %5097 = vmatpush1.bf16.msra.mxu1 %v5096_v39  ;;  %3312 = vmatprep.mubr.f32.mxu1 %v7676_v19  ;;  %v7715_v39 = vpack.c.bf16 %v7118_v9, %v7093_v38  ;;  %v7716_v9 = vpack.c.bf16 %v7111_v49, %v7088_v12  ;;  %v7720_v12 = vpack.c.bf16 %v7181_v15, %v7163_v33  ;;  %v7726_v33 = vld [vmem:[#allocation6_spill] sm:$0xff]  ;;  %s4870_s29 = sshll.u32 %s5817_s9, 4  ;;  %s4871_s29 = int_to_ptr.vmem [resolvable:$true] %s4870_s29 }
 0x4ea   :  { %5099 = vmatprep.subr.bf16.mxu1 %v5098_v8  ;;  %v3350_v8 = vand.u32 4294901760, %v3349_v55  ;;  %v7721_v49 = vpack.c.bf16 %v7240_v45, %v7217_v0  ;;  %s5791_s30 = scalar_lea.vmem %s4871_s29, 256  ;;  %p5796_p1 = scmp.lt.s32.totalorder %s4871_s29, %s4871_s29 }
 0x4eb   :  { %p5792_p0 = scmp.ne.s32.totalorder %s4871_s29, %s5791_s30  ;;  %p5797_p2 = scmp.lt.s32.totalorder %s5791_s30, %s5791_s30 }
 0x4ec   :  { %3318 = vmatmul.mubr.f32.gmra.mrb[38].mxu1 %v3317_v59 }
 0x4ed   :  { %5101 = vmatpush1.bf16.msra.mxu1 %v5100_v47  ;;  %3323 = vmatprep.mubr.f32.mxu1 %v7676_v19  ;;  %v3360_v47 = vsub.f32 %v7319_v24, %v3359_v53  ;;  %p5798_p3 = por %p5797_p2, %p5796_p1 }
 0x4ee   :  { %5103 = vmatprep.subr.bf16.mxu1 %v7715_v39 }
 0x4ef   :  { %v3361_v38 = vand.u32 4294901760, %v3360_v47  ;;  %p5799_p4 = pnand %p5798_p3, %p5792_p0 }
 0x4f0   :  { %3329 = vmatmul.mubr.f32.gmra.mrb[40].mxu1 %v3328_v58 }
 0x4f1   :  { %3334 = vmatprep.mubr.f32.mxu1 %v7676_v19 }
 0x4f4   :  { %3340 = vmatmul.mubr.f32.gmra.mrb[42].mxu1 %v3339_v36 }
 0x4f5   :  { %3345 = vmatprep.mubr.f32.mxu1 %v7676_v19 }
 0x4f8   :  { %3351 = vmatmul.mubr.f32.gmra.mrb[44].mxu1 %v3350_v8 }
 0x4f9   :  { %3356 = vmatprep.mubr.f32.mxu1 %v7676_v19 }
 0x4fc   :  { %3362 = vmatmul.mubr.f32.gmra.mrb[46].mxu1 %v3361_v38 }
 0x4fd   :  { %3512 = vmatprep.mubr.f32.mxu1 %v7676_v19 }
 0x500   :  { %3514 = vmatmul.mubr.f32.vlgmr.msra.gmra.mrb[32].mxu1 %v7064_v4 }
 0x501   :  { %5105 = vmatpush1.bf16.msra.mxu1 %v7716_v9  ;;  %3519 = vmatprep.mubr.f32.mxu1 %v7676_v19 }
 0x502   :  { %5107 = vmatprep.subr.bf16.mxu1 %v7717_v16 }
 0x504   :  { %3521 = vmatmul.mubr.f32.gmra.mrb[34].mxu1 %v7070_v40 }
 0x505   :  { %5109 = vmatpush1.bf16.msra.mxu1 %v7718_v7  ;;  %3526 = vmatprep.mubr.f32.mxu1 %v7676_v19 }
 0x506   :  { %5111 = vmatprep.subr.bf16.mxu1 %v7719_v41 }
 0x508   :  { %3528 = vmatmul.mubr.f32.gmra.mrb[36].mxu1 %v7086_v56 }
 0x509   :  { %5113 = vmatpush1.bf16.msra.mxu1 %v7720_v12  ;;  %3533 = vmatprep.mubr.f32.mxu1 %v7676_v19 }
 0x50a   :  { %5115 = vmatprep.subr.bf16.mxu1 %v7721_v49 }
 0x50c   :  { %3535 = vmatmul.mubr.f32.gmra.mrb[38].mxu1 %v7201_v1 }
 0x50d   :  { %5117 = vmatpush1.bf16.msra.mxu1 %v7722_v14  ;;  %3540 = vmatprep.mubr.f32.mxu1 %v7676_v19 }
 0x50e   :  { %5119 = vmatprep.subr.bf16.mxu1 %v7116_v2 }
 0x510   :  { %3542 = vmatmul.mubr.f32.gmra.mrb[40].mxu1 %v7257_v18 }
 0x511   :  { %3547 = vmatprep.mubr.f32.mxu1 %v7676_v19 }
 0x514   :  { %3549 = vmatmul.mubr.f32.gmra.mrb[42].mxu1 %v7283_v10 }
 0x515   :  { %3554 = vmatprep.mubr.f32.mxu1 %v7676_v19 }
 0x518   :  { %3556 = vmatmul.mubr.f32.gmra.mrb[44].mxu1 %v7299_v27 }
 0x519   :  { %3561 = vmatprep.mubr.f32.mxu1 %v7676_v19 }
 0x51c   :  { %3563 = vmatmul.mubr.f32.gmra.mrb[46].mxu1 %v7311_v30 }
 0x51d   :  { %3665 = vmatprep.mubr.f32.mxu1 %v7676_v19 }
 0x520   :  { %3668 = vmatmul.mubr.f32.vlgmr.msra.gmra.mrb[32].mxu1 %v7068_v51  ;;  %v7727_v51 = vld [vmem:[#allocation7_spill] sm:$0xff] }
 0x521   :  { %5121 = vmatpush1.bf16.msra.mxu1 %v7109_v37  ;;  %3673 = vmatprep.mubr.f32.mxu1 %v7676_v19 }
 0x522   :  { %5123 = vmatprep.subr.bf16.mxu1 %v7147_v42 }
 0x524   :  { %3676 = vmatmul.mubr.f32.gmra.mrb[34].mxu1 %v7077_v22  ;;  %v7728_v22 = vld [vmem:[#allocation8_spill] sm:$0xff] }
 0x525   :  { %5125 = vmatpush1.bf16.msra.mxu1 %v7141_v29  ;;  %3681 = vmatprep.mubr.f32.mxu1 %v7676_v19 }
 0x526   :  { %5127 = vmatprep.subr.bf16.mxu1 %v7190_v13 }
 0x528   :  { %3684 = vmatmul.mubr.f32.gmra.mrb[36].mxu1 %v7103_v23 }
 0x529   :  { %5129 = vmatpush1.bf16.msra.mxu1 %v7179_v20  ;;  %3689 = vmatprep.mubr.f32.mxu1 %v7676_v19 }
 0x52a   :  { %5131 = vmatprep.subr.bf16.mxu1 %v7238_v5 }
 0x52c   :  { %3692 = vmatmul.mubr.f32.gmra.mrb[38].mxu1 %v7248_v54 }
 0x52d   :  { %5133 = vmatpush1.bf16.msra.mxu1 %v7233_v17  ;;  %3697 = vmatprep.mubr.f32.mxu1 %v7676_v19 }
 0x52e   :  { %5135 = vmatprep.subr.bf16.mxu1 %v7176_v25 }
 0x530   :  { %3700 = vmatmul.mubr.f32.gmra.mrb[40].mxu1 %v7281_v21 }
 0x531   :  { %3705 = vmatprep.mubr.f32.mxu1 %v7676_v19 }
 0x534   :  { %3708 = vmatmul.mubr.f32.gmra.mrb[42].mxu1 %v7297_v52 }
 0x535   :  { %3713 = vmatprep.mubr.f32.mxu1 %v7676_v19 }
 0x538   :  { %3716 = vmatmul.mubr.f32.gmra.mrb[44].mxu1 %v7309_v31 }
 0x539   :  { %3721 = vmatprep.mubr.f32.mxu1 %v7676_v19 }
 0x53c   :  { %3724 = vmatmul.mubr.f32.gmra.mrb[46].mxu1 %v7319_v24 }
 0x53d   :  { %3810 = vmatprep.mubr.f32.mxu1 %v7676_v19 }
 0x540   :  { %3814 = vmatmul.mubr.f32.vlgmr.msra.gmra.mrb[32].mxu1 %v7723_v46 }
 0x541   :  { %5137 = vmatpush1.bf16.msra.mxu1 %v7188_v28  ;;  %3819 = vmatprep.mubr.f32.mxu1 %v7676_v19  ;;  %v4213_v28 = vsel %vm1002_vm1, %v4205_v44, 0 }
 0x542   :  { %5139 = vmatprep.subr.bf16.mxu1 %v7724_v34  ;;  %v7473_v57 = vand.u32 4294901760, %v4213_v28 }
 0x544   :  { %3823 = vmatmul.mubr.f32.gmra.mrb[34].mxu1 %v7725_v50 }
 0x545   :  { %5141 = vmatpush1.bf16.msra.mxu1 %v7225_v62  ;;  %3828 = vmatprep.mubr.f32.mxu1 %v7676_v19 }
 0x546   :  { %5143 = vmatprep.subr.bf16.mxu1 %v7726_v33 }
 0x548   :  { %3832 = vmatmul.mubr.f32.gmra.mrb[36].mxu1 %v3304_v35 }
 0x549   :  { %5145 = vmatpush1.bf16.msra.mxu1 %v7727_v51  ;;  %3837 = vmatprep.mubr.f32.mxu1 %v7676_v19 }
 0x54a   :  { %5147 = vmatprep.subr.bf16.mxu1 %v7272_v11  ;;  %v7476_v11 = vsub.f32 %v4213_v28, %v7473_v57 }
 0x54c   :  { %3841 = vmatmul.mubr.f32.gmra.mrb[38].mxu1 %v3315_v63 }
 0x54d   :  { %5149 = vmatpush1.bf16.msra.mxu1 %v7728_v22  ;;  %3846 = vmatprep.mubr.f32.mxu1 %v7676_v19 }
 0x54e   :  { %5151 = vmatprep.subr.bf16.mxu1 %v7116_v2 }
 0x550   :  { %3850 = vmatmul.mubr.f32.gmra.mrb[40].mxu1 %v3326_v60 }
 0x551   :  { %3855 = vmatprep.mubr.f32.mxu1 %v7676_v19 }
 0x554   :  { %3859 = vmatmul.mubr.f32.gmra.mrb[42].mxu1 %v3337_v48 }
 0x555   :  { %3864 = vmatprep.mubr.f32.mxu1 %v7676_v19 }
 0x558   :  { %3868 = vmatmul.mubr.f32.gmra.mrb[44].mxu1 %v3348_v43  ;;  %v4298_v43 = vand.u32 4294901760, %v7476_v11 }
 0x559   :  { %3873 = vmatprep.mubr.f32.mxu1 %v7676_v19 }
 0x55c   :  { %3877 = vmatmul.mubr.f32.gmra.mrb[46].mxu1 %v3359_v53 }
 0x55d   :  { %3995 = vmatprep.mubr.f32.mxu1 %v7676_v19 }
 0x560   :  { %3997 = vmatmul.mubr.f32.vlgmr.msra.gmra.mrb[32].mxu1 %v7064_v4 }
 0x561   :  { %5153 = vmatpush1.bf16.msra.mxu1 %v7109_v37  ;;  %4002 = vmatprep.mubr.f32.mxu1 %v7676_v19  ;;  %v3143_v37 = vpop.permute.xlu1 %3142 }
 0x562   :  { %5155 = vmatprep.subr.bf16.mxu1 %v7147_v42 }
 0x564   :  { %4004 = vmatmul.mubr.f32.gmra.mrb[34].mxu1 %v7070_v40 }
 0x565   :  { %5157 = vmatpush1.bf16.msra.mxu1 %v7141_v29  ;;  %4009 = vmatprep.mubr.f32.mxu1 %v7676_v19  ;;  %v3153_v26 = vpop.permute.xlu1 %3152 }
 0x566   :  { %5159 = vmatprep.subr.bf16.mxu1 %v7190_v13 }
 0x568   :  { %4011 = vmatmul.mubr.f32.gmra.mrb[36].mxu1 %v7086_v56 }
 0x569   :  { %5161 = vmatpush1.bf16.msra.mxu1 %v7179_v20  ;;  %4016 = vmatprep.mubr.f32.mxu1 %v7676_v19  ;;  %v3163_v24 = vpop.permute.xlu1 %3162 }
 0x56a   :  { %5163 = vmatprep.subr.bf16.mxu1 %v7238_v5 }
 0x56c   :  { %4018 = vmatmul.mubr.f32.gmra.mrb[38].mxu1 %v7201_v1 }
 0x56d   :  { %5165 = vmatpush1.bf16.msra.mxu1 %v7233_v17  ;;  %4023 = vmatprep.mubr.f32.mxu1 %v7676_v19 }
 0x570   :  { %4025 = vmatmul.mubr.f32.gmra.mrb[40].mxu1 %v7257_v18 }
 0x571   :  { %4030 = vmatprep.mubr.f32.mxu1 %v7676_v19 }
 0x574   :  { %4032 = vmatmul.mubr.f32.gmra.mrb[42].mxu1 %v7283_v10 }
 0x575   :  { %4037 = vmatprep.mubr.f32.mxu1 %v7676_v19 }
 0x578   :  { %4039 = vmatmul.mubr.f32.gmra.mrb[44].mxu1 %v7299_v27 }
 0x579   :  { %4044 = vmatprep.mubr.f32.mxu1 %v7676_v19 }
 0x57c   :  { %4046 = vmatmul.mubr.f32.gmra.mrb[46].mxu1 %v7311_v30 }
 0x57d   :  { %4132 = vmatprep.mubr.f32.mxu1 %v7676_v19 }
 0x580   :  { %4134 = vmatmul.mubr.f32.vlgmr.msra.gmra.mrb[32].mxu1 %v7064_v4  ;;  %v3138_v4 = vpop.permute.xlu0 %3137 }
 0x581   :  { %4139 = vmatprep.mubr.f32.mxu1 %v7676_v19 }
 0x584   :  { %4141 = vmatmul.mubr.f32.gmra.mrb[34].mxu1 %v7070_v40  ;;  %v3148_v20 = vpop.permute.xlu0 %3147 }
 0x585   :  { %4146 = vmatprep.mubr.f32.mxu1 %v7676_v19 }
 0x588   :  { %4148 = vmatmul.mubr.f32.gmra.mrb[36].mxu1 %v7086_v56 }
 0x589   :  { %4153 = vmatprep.mubr.f32.mxu1 %v7676_v19 }
 0x58c   :  { %4155 = vmatmul.mubr.f32.gmra.mrb[38].mxu1 %v7201_v1 }
 0x58d   :  { %4160 = vmatprep.mubr.f32.mxu1 %v7676_v19 }
 0x590   :  { %4162 = vmatmul.mubr.f32.gmra.mrb[40].mxu1 %v7257_v18  ;;  %v3158_v18 = vpop.permute.xlu0 %3157 }
 0x591   :  { %4167 = vmatprep.mubr.f32.mxu1 %v7676_v19 }
 0x594   :  { %4169 = vmatmul.mubr.f32.gmra.mrb[42].mxu1 %v7283_v10  ;;  %v3168_v51 = vpop.permute.xlu0 %3167 }
 0x595   :  { %4174 = vmatprep.mubr.f32.mxu1 %v7676_v19 }
 0x598   :  { %4176 = vmatmul.mubr.f32.gmra.mrb[44].mxu1 %v7299_v27 }
 0x599   :  { %4181 = vmatprep.mubr.f32.mxu1 %v7676_v19 }
 0x59c   :  { %4183 = vmatmul.mubr.f32.gmra.mrb[46].mxu1 %v7311_v30 }
 0x59d   :  { %4295 = vmatprep.mubr.f32.mxu1 %v7676_v19 }
 0x653   :  { %v4135_v40 = vpop.f32.mrb[32].mxu1 }
 0x654   :  { %v5326_v56 = vadd.f32 %v4135_v40, %v3138_v4  ;;  %v4137_v17 = vpop.f32.mrb[33].mxu1 }
 0x655   :  { %v5327_v23 = vadd.f32 %v4137_v17, %v3138_v4 }
 0x656   :  { %5759 = vtanh.f32 %v5326_v56 }
 0x657   :  { %5761 = vtanh.f32 %v5327_v23  ;;  %v4142_v2 = vpop.f32.mrb[34].mxu1 }
 0x658   :  { %v5328_v29 = vadd.f32 %v4142_v2, %v3143_v37  ;;  %v4144_v42 = vpop.f32.mrb[35].mxu1 }
 0x659   :  { %v5329_v25 = vadd.f32 %v4144_v42, %v3143_v37 }
 0x65a   :  { %5763 = vtanh.f32 %v5328_v29 }
 0x65b   :  { %5765 = vtanh.f32 %v5329_v25  ;;  %v4149_v15 = vpop.f32.mrb[36].mxu1 }
 0x65c   :  { %v5330_v13 = vadd.f32 %v4149_v15, %v3148_v20  ;;  %v4151_v3 = vpop.f32.mrb[37].mxu1 }
 0x65d   :  { %v5331_v1 = vadd.f32 %v4151_v3, %v3148_v20 }
 0x65e   :  { %5767 = vtanh.f32 %v5330_v13 }
 0x65f   :  { %5769 = vtanh.f32 %v5331_v1  ;;  %v4156_v0 = vpop.f32.mrb[38].mxu1 }
 0x660   :  { %v5760_v62 = vpop.eup %5759  ;;  %v5332_v10 = vadd.f32 %v4156_v0, %v3153_v26  ;;  %v4158_v21 = vpop.f32.mrb[39].mxu1 }
 0x661   :  { %v5762_v5 = vpop.eup %5761  ;;  %v5333_v45 = vadd.f32 %v4158_v21, %v3153_v26  ;;  %v4217_v35 = vand.u32 4294901760, %v5760_v62  ;;  %v3173_v26 = vpop.permute.xlu1 %3172 }
 0x662   :  { %5771 = vtanh.f32 %v5332_v10  ;;  %v4215_v54 = vand.u32 4294901760, %v5762_v5 }
 0x663   :  { %5773 = vtanh.f32 %v5333_v45  ;;  %v4163_v63 = vpop.f32.mrb[40].mxu1  ;;  %v7478_v60 = vsub.f32 %v5760_v62, %v4217_v35 }
 0x664   :  { %v5764_v52 = vpop.eup %5763  ;;  %v5334_v27 = vadd.f32 %v4163_v63, %v3158_v18  ;;  %v4165_v61 = vpop.f32.mrb[41].mxu1  ;;  %v7480_v59 = vsub.f32 %v5762_v5, %v4215_v54 }
 0x665   :  { %v5766_v6 = vpop.eup %5765  ;;  %v5335_v48 = vadd.f32 %v4165_v61, %v3158_v18  ;;  %v4221_v31 = vand.u32 4294901760, %v5764_v52  ;;  %v4315_v30 = vand.u32 4294901760, %v7478_v60 }
 0x666   :  { %5775 = vtanh.f32 %v5334_v27  ;;  %v4219_v58 = vand.u32 4294901760, %v5766_v6  ;;  %v4309_v32 = vand.u32 4294901760, %v7480_v59 }
 0x667   :  { %5777 = vtanh.f32 %v5335_v48  ;;  %v4170_v39 = vpop.f32.mrb[42].mxu1  ;;  %v7485_v36 = vpack.c.bf16 %v4221_v31, %v4217_v35  ;;  %v7487_v55 = vsub.f32 %v5764_v52, %v4221_v31  ;;  %v4316_v53 = vsub.f32 %v7478_v60, %v4315_v30 }
 0x668   :  { %v5768_v8 = vpop.eup %5767  ;;  %v5336_v47 = vadd.f32 %v4170_v39, %v3163_v24  ;;  %v4172_v38 = vpop.f32.mrb[43].mxu1  ;;  %v7492_v9 = vpack.c.bf16 %v4219_v58, %v4215_v54  ;;  %v7494_v16 = vsub.f32 %v5766_v6, %v4219_v58  ;;  %v4310_v7 = vsub.f32 %v7480_v59, %v4309_v32 }
 0x669   :  { %v5770_v41 = vpop.eup %5769  ;;  %v5337_v12 = vadd.f32 %v4172_v38, %v3163_v24  ;;  %v4225_v49 = vand.u32 4294901760, %v5768_v8  ;;  %v4317_v14 = vand.u32 4294901760, %v4316_v53  ;;  %v4327_v46 = vand.u32 4294901760, %v7487_v55 }
 0x66a   :  { %5779 = vtanh.f32 %v5336_v47  ;;  %5167 = vmatprep.subr.bf16.mxu1 %v7492_v9  ;;  %v4223_v34 = vand.u32 4294901760, %v5770_v41  ;;  %v4311_v50 = vand.u32 4294901760, %v4310_v7  ;;  %v4321_v33 = vand.u32 4294901760, %v7494_v16 }
 0x66b   :  { %5781 = vtanh.f32 %v5337_v12  ;;  %v4177_v22 = vpop.f32.mrb[44].mxu1  ;;  %5169 = vmatpush1.bf16.msra.mxu1 %v7485_v36  ;;  %v7503_v4 = vsub.f32 %v5768_v8, %v4225_v49  ;;  %v4328_v40 = vsub.f32 %v7487_v55, %v4327_v46  ;;  %v5198_v56 = vpack.c.bf16 %v7494_v16, %v7480_v59  ;;  %v4210_v59 = vpop.permute.xlu0 %4209 }
 0x66c   :  { %v5772_v17 = vpop.eup %5771  ;;  %v5338_v23 = vadd.f32 %v4177_v22, %v3168_v51  ;;  %v4179_v37 = vpop.f32.mrb[45].mxu1  ;;  %v7510_v2 = vsub.f32 %v5770_v41, %v4223_v34  ;;  %v4322_v29 = vsub.f32 %v7494_v16, %v4321_v33  ;;  %v5200_v42 = vpack.c.bf16 %v7487_v55, %v7478_v60 }
 0x66d   :  { %v5774_v44 = vpop.eup %5773  ;;  %v5339_v25 = vadd.f32 %v4179_v37, %v3168_v51  ;;  %v4229_v20 = vand.u32 4294901760, %v5772_v17  ;;  %v4329_v15 = vand.u32 4294901760, %v4328_v40  ;;  %v4339_v28 = vand.u32 4294901760, %v7503_v4 }
 0x66e   :  { %5783 = vtanh.f32 %v5338_v23  ;;  %v4227_v13 = vand.u32 4294901760, %v5774_v44  ;;  %v4323_v3 = vand.u32 4294901760, %v4322_v29  ;;  %v4333_v1 = vand.u32 4294901760, %v7510_v2 }
 0x66f   :  { %5785 = vtanh.f32 %v5339_v25  ;;  %v4184_v0 = vpop.f32.mrb[46].mxu1  ;;  %v7517_v62 = vpack.c.bf16 %v4229_v20, %v4225_v49  ;;  %v7519_v10 = vsub.f32 %v5772_v17, %v4229_v20  ;;  %v5184_v21 = vpack.c.bf16 %v4329_v15, %v4317_v14 }
 0x670   :  { %v5776_v5 = vpop.eup %5775  ;;  %v5340_v45 = vadd.f32 %v4184_v0, %v3173_v26  ;;  %v4186_v35 = vpop.f32.mrb[47].mxu1  ;;  %v7521_v54 = vpack.c.bf16 %v4227_v13, %v4223_v34  ;;  %v7523_v18 = vsub.f32 %v5774_v44, %v4227_v13  ;;  %v5182_v63 = vpack.c.bf16 %v4323_v3, %v4311_v50 }
 0x671   :  { %v5778_v52 = vpop.eup %5777  ;;  %v5341_v27 = vadd.f32 %v4186_v35, %v3173_v26  ;;  %v4334_v61 = vsub.f32 %v7510_v2, %v4333_v1  ;;  %v4233_v6 = vand.u32 4294901760, %v5776_v5  ;;  %v4340_v48 = vsub.f32 %v7503_v4, %v4339_v28 }
 0x672   :  { %5787 = vtanh.f32 %v5340_v45  ;;  %5171 = vmatprep.subr.bf16.mxu1 %v7521_v54  ;;  %5183 = vmatprep.subr.bf16.mxu0 %v5182_v63  ;;  %v4231_v31 = vand.u32 4294901760, %v5778_v52  ;;  %v4345_v58 = vand.u32 4294901760, %v7523_v18  ;;  %v4351_v24 = vand.u32 4294901760, %v7519_v10 }
 0x673   :  { %5789 = vtanh.f32 %v5341_v27  ;;  %5173 = vmatpush1.bf16.msra.mxu1 %v7517_v62  ;;  %5185 = vmatpush1.bf16.msra.mxu0 %v5184_v21  ;;  %v4335_v39 = vand.u32 4294901760, %v4334_v61  ;;  %v7535_v53 = vsub.f32 %v5776_v5, %v4233_v6  ;;  %v4341_v8 = vand.u32 4294901760, %v4340_v48 }
 0x674   :  { %v5780_v47 = vpop.eup %5779  ;;  %v7537_v38 = vsub.f32 %v5778_v52, %v4231_v31  ;;  %v4346_v7 = vsub.f32 %v7523_v18, %v4345_v58  ;;  %v4352_v41 = vsub.f32 %v7519_v10, %v4351_v24  ;;  %v5202_v12 = vpack.c.bf16 %v7523_v18, %v7510_v2 }
 0x675   :  { %v5782_v49 = vpop.eup %5781  ;;  %v4237_v14 = vand.u32 4294901760, %v5780_v47  ;;  %v4363_v34 = vand.u32 4294901760, %v7535_v53  ;;  %v5204_v50 = vpack.c.bf16 %v7519_v10, %v7503_v4  ;;  %v7548_v51 = vpack.c.bf16 %v4321_v33, %v4309_v32 }
 0x676   :  { %v4235_v22 = vand.u32 4294901760, %v5782_v49  ;;  %v4347_v40 = vand.u32 4294901760, %v4346_v7  ;;  %v4353_v17 = vand.u32 4294901760, %v4352_v41  ;;  %v4357_v23 = vand.u32 4294901760, %v7537_v38 }
 0x677   :  { %v7551_v37 = vpack.c.bf16 %v4237_v14, %v4233_v6  ;;  %v7553_v29 = vsub.f32 %v5780_v47, %v4237_v14  ;;  %v4364_v44 = vsub.f32 %v7535_v53, %v4363_v34  ;;  %v7560_v25 = vpack.c.bf16 %v4327_v46, %v4315_v30 }
 0x678   :  { %v5784_v20 = vpop.eup %5783  ;;  %v7562_v32 = vpack.c.bf16 %v4235_v22, %v4231_v31  ;;  %v7564_v33 = vsub.f32 %v5782_v49, %v4235_v22  ;;  %v5186_v15 = vpack.c.bf16 %v4347_v40, %v4335_v39  ;;  %v5188_v13 = vpack.c.bf16 %v4353_v17, %v4341_v8 }
 0x679   :  { %v5786_v3 = vpop.eup %5785  ;;  %v4358_v26 = vsub.f32 %v7537_v38, %v4357_v23  ;;  %v4241_v0 = vand.u32 4294901760, %v5784_v20  ;;  %v4375_v21 = vand.u32 4294901760, %v7553_v29  ;;  %v4299_v5 = vsub.f32 %v7476_v11, %v4298_v43 }
 0x67a   :  { %5175 = vmatprep.subr.bf16.mxu1 %v7562_v32  ;;  %5187 = vmatprep.subr.bf16.mxu0 %v5186_v15  ;;  %v4239_v30 = vand.u32 4294901760, %v5786_v3  ;;  %v4369_v46 = vand.u32 4294901760, %v7564_v33  ;;  %v5206_v45 = vpack.c.bf16 %v7564_v33, %v7537_v38  ;;  %v5208_v35 = vpack.c.bf16 %v7553_v29, %v7535_v53 }
 0x67b   :  { %5177 = vmatpush1.bf16.msra.mxu1 %v7551_v37  ;;  %5189 = vmatpush1.bf16.msra.mxu0 %v5188_v13  ;;  %v4386_v63 = vsub.f32 %v5784_v20, %v4241_v0  ;;  %v4365_v52 = vand.u32 4294901760, %v4364_v44  ;;  %v4376_v27 = vsub.f32 %v7553_v29, %v4375_v21  ;;  %v7581_v61 = vpack.c.bf16 %v4345_v58, %v4333_v1 }
 0x67c   :  { %v5788_v6 = vpop.eup %5787  ;;  %v4380_v48 = vsub.f32 %v5786_v3, %v4239_v30  ;;  %v4370_v31 = vsub.f32 %v7564_v33, %v4369_v46  ;;  %v7586_v39 = vpack.c.bf16 %v4351_v24, %v4339_v28  ;;  %v7588_v53 = vpack.c.bf16 %v4369_v46, %v4357_v23 }
 0x67d   :  { %v5790_v8 = vpop.eup %5789  ;;  %v4245_v47 = vand.u32 4294901760, %v5788_v6  ;;  %v4377_v38 = vand.u32 4294901760, %v4376_v27  ;;  %v4387_v7 = vand.u32 4294901760, %v4386_v63  ;;  %v5240_v41 = vpack.c.bf16 %v4375_v21, %v4363_v34 }
 0x67e   :  { %v4243_v49 = vand.u32 4294901760, %v5790_v8  ;;  %v4359_v14 = vand.u32 4294901760, %v4358_v26  ;;  %v4371_v22 = vand.u32 4294901760, %v4370_v31  ;;  %v4381_v1 = vand.u32 4294901760, %v4380_v48 }
 0x67f   :  { %v7590_v58 = vpack.c.bf16 %v4245_v47, %v4241_v0  ;;  %v4398_v40 = vsub.f32 %v5788_v6, %v4245_v47  ;;  %v5192_v17 = vpack.c.bf16 %v4377_v38, %v4365_v52  ;;  %v4388_v24 = vsub.f32 %v4386_v63, %v4387_v7 }
 0x680   :  { %v7592_v29 = vpack.c.bf16 %v4243_v49, %v4239_v30  ;;  %v4392_v44 = vsub.f32 %v5790_v8, %v4243_v49  ;;  %v5190_v28 = vpack.c.bf16 %v4371_v22, %v4359_v14  ;;  %v4300_v33 = vand.u32 4294901760, %v4299_v5 }
 0x681   :  { %v4399_v23 = vand.u32 4294901760, %v4398_v40  ;;  %v5212_v20 = vpack.c.bf16 %v4398_v40, %v4386_v63  ;;  %v4382_v34 = vsub.f32 %v4380_v48, %v4381_v1  ;;  %v4389_v30 = vand.u32 4294901760, %v4388_v24 }
 0x682   :  { %5179 = vmatprep.subr.bf16.mxu1 %v7592_v29  ;;  %5191 = vmatprep.subr.bf16.mxu0 %v5190_v28  ;;  %v4393_v15 = vand.u32 4294901760, %v4392_v44  ;;  %v5210_v13 = vpack.c.bf16 %v4392_v44, %v4380_v48 }
 0x683   :  { %5181 = vmatpush1.bf16.msra.mxu1 %v7590_v58  ;;  %5193 = vmatpush1.bf16.msra.mxu0 %v5192_v17  ;;  %v4400_v3 = vsub.f32 %v4398_v40, %v4399_v23  ;;  %v5244_v26 = vpack.c.bf16 %v4399_v23, %v4387_v7  ;;  %v4383_v52 = vand.u32 4294901760, %v4382_v34 }
 0x684   :  { %v4394_v0 = vsub.f32 %v4392_v44, %v4393_v15  ;;  %v5242_v21 = vpack.c.bf16 %v4393_v15, %v4381_v1 }
 0x685   :  { %v4401_v46 = vand.u32 4294901760, %v4400_v3 }
 0x686   :  { %4301 = vmatmul.mubr.f32.vlgmr.msra.gmra.mrb[48].mxu1 %v4300_v33  ;;  %v4395_v27 = vand.u32 4294901760, %v4394_v0 }
 0x687   :  { %v5196_v63 = vpack.c.bf16 %v4401_v46, %v4389_v30 }
 0x688   :  { %v5194_v6 = vpack.c.bf16 %v4395_v27, %v4383_v52 }
 0x68a   :  { %5195 = vmatprep.subr.bf16.mxu0 %v5194_v6 }
 0x68b   :  { %5197 = vmatpush1.bf16.msra.mxu0 %v5196_v63 }
 0x68c   :  { %5199 = vmatprep.subr.bf16.mxu0 %v5198_v56 }
 0x68e   :  { %4453 = vmatmul.mubr.f32.vlgmr.msra.gmra.mrb[32].mxu0 %v7473_v57 }
 0x68f   :  { %5201 = vmatpush1.bf16.msra.mxu0 %v5200_v42  ;;  %4555 = vmatprep.mubr.f32.mxu0 %v7676_v19 }
 0x690   :  { %5203 = vmatprep.subr.bf16.mxu0 %v5202_v12 }
 0x693   :  { %5205 = vmatpush1.bf16.msra.mxu0 %v5204_v50 }
 0x694   :  { %5207 = vmatprep.subr.bf16.mxu0 %v5206_v45 }
 0x697   :  { %5209 = vmatpush1.bf16.msra.mxu0 %v5208_v35 }
 0x698   :  { %5211 = vmatprep.subr.bf16.mxu0 %v5210_v13 }
 0x69b   :  { %5213 = vmatpush1.bf16.msra.mxu0 %v5212_v20 }
 0x69c   :  { %5215 = vmatprep.subr.bf16.mxu0 %v7492_v9 }
 0x69e   :  { %4558 = vmatmul.mubr.f32.vlgmr.msra.gmra.mrb[32].mxu0 %v7476_v11 }
 0x69f   :  { %5217 = vmatpush1.bf16.msra.mxu0 %v7485_v36  ;;  %4644 = vmatprep.mubr.f32.mxu0 %v7676_v19 }
 0x6a0   :  { %5219 = vmatprep.subr.bf16.mxu0 %v7521_v54 }
 0x6a3   :  { %5221 = vmatpush1.bf16.msra.mxu0 %v7517_v62 }
 0x6a4   :  { %5223 = vmatprep.subr.bf16.mxu0 %v7562_v32 }
 0x6a7   :  { %5225 = vmatpush1.bf16.msra.mxu0 %v7551_v37 }
 0x6a8   :  { %5227 = vmatprep.subr.bf16.mxu0 %v7592_v29 }
 0x6ab   :  { %5229 = vmatpush1.bf16.msra.mxu0 %v7590_v58 }
 0x6ac   :  { %5231 = vmatprep.subr.bf16.mxu0 %v7548_v51 }
 0x6ae   :  { %4648 = vmatmul.mubr.f32.vlgmr.msra.gmra.mrb[32].mxu0 %v4298_v43 }
 0x6af   :  { %5233 = vmatpush1.bf16.msra.mxu0 %v7560_v25  ;;  %4766 = vmatprep.mubr.f32.mxu0 %v7676_v19 }
 0x6b0   :  { %5235 = vmatprep.subr.bf16.mxu0 %v7581_v61 }
 0x6b3   :  { %5237 = vmatpush1.bf16.msra.mxu0 %v7586_v39 }
 0x6b4   :  { %5239 = vmatprep.subr.bf16.mxu0 %v7588_v53 }
 0x6b7   :  { %5241 = vmatpush1.bf16.msra.mxu0 %v5240_v41 }
 0x6b8   :  { %5243 = vmatprep.subr.bf16.mxu0 %v5242_v21 }
 0x6bb   :  { %5245 = vmatpush1.bf16.msra.mxu0 %v5244_v26 }
 0x6bc   :  { %5247 = vmatprep.subr.bf16.mxu0 %v7492_v9 }
 0x6be   :  { %4768 = vmatmul.mubr.f32.vlgmr.msra.gmra.mrb[32].mxu0 %v7473_v57 }
 0x6bf   :  { %5249 = vmatpush1.bf16.msra.mxu0 %v7485_v36  ;;  %4854 = vmatprep.mubr.f32.mxu0 %v7676_v19 }
 0x6c0   :  { %5251 = vmatprep.subr.bf16.mxu0 %v7521_v54 }
 0x6c3   :  { %5253 = vmatpush1.bf16.msra.mxu0 %v7517_v62 }
 0x6c4   :  { %5255 = vmatprep.subr.bf16.mxu0 %v7562_v32 }
 0x6c7   :  { %5257 = vmatpush1.bf16.msra.mxu0 %v7551_v37 }
 0x6c8   :  { %5259 = vmatprep.subr.bf16.mxu0 %v7592_v29 }
 0x6cb   :  { %5261 = vmatpush1.bf16.msra.mxu0 %v7590_v58 }
 0x6ce   :  { %4856 = vmatmul.mubr.f32.vlgmr.msra.gmra.mrb[32].mxu0 %v7473_v57 }
 0x759   :  { %v4302_v11 = vpop.f32.mrb[48].mxu1 }
 0x75a   :  { %v4304_v60 = vpop.f32.mrb[49].mxu1  ;;  %v4303_v43 = vadd.f32 %v4302_v11, %v4210_v59 }
 0x75b   :  { %v4305_v19 = vadd.f32 %v4304_v60, %v4210_v59 }
 0x7a1   :  { %v4857_v36 = vpop.f32.mrb[32].mxu0 }
 0x7a2   :  { %v5343_v55 = vadd.f32 %v4857_v36, %v4303_v43  ;;  %v4859_v9 = vpop.f32.mrb[33].mxu0 }
 0x7a3   :  { %v5345_v16 = vadd.f32 %v4859_v9, %v4305_v19 }
 0x7a4   :  { %4862 = vst [vmem:[#allocation2] sm:$0xff] %v5343_v55 }
 0x7a5   :  { %4863 = vst [vmem:[#allocation2 + $0x8] sm:$0xff] %v5345_v16 }
 0x7a6   :  { %5802 = shalt.err (!%p5799_p4)
}
 0x7a7   :  { %s5803_s14 = scalar_lea.hbm %s7662_s11, 256 }
 0x7a8   :  { %p5804_p5 = scmp.ne.s32.totalorder %s7662_s11, %s5803_s14  ;;  %p5807_p6 = scmp.lt.u32.totalorder %s5803_s14, %s7662_s11 }
 0x7aa   :  { %p5809_p7 = pnand %p5807_p6, %p5804_p5 }
 0x7ac   :  { %5812 = shalt.err (!%p5809_p7)
}
 0x7ad   :  { %4873 = dma.vmem_to_hbm [thread:$0]  %s4871_s29, 256, %s7662_s11, [#allocation3]  }
 0x7ae   :  { %5813 = dma.done.wait [#allocation3], 256  }
 0x7af   :  { %5814 = vsyncadd [#allocation3], 4294967040 }
 0x7b0   :  { %4877 = vsyncpa [#allocation3], 1 }

</bundles_post_ra>
